<compile_context>
chip_gen: v7x
topology: tpu7x:2x2x1
jax: 0.10.0
libtpu: 0.0.40
codegen_flags: <defaults>
</compile_context>

<pallas_src>
import functools
import math

import jax
import jax.numpy as jnp
from jax.experimental import pallas as pl
from jax.experimental.pallas import tpu as pltpu


# ----------------------------------------------------------------------------
# Fused kernel: Time2Vector -> N encoder layers -> flatten/head
# ----------------------------------------------------------------------------
def fused_transformer_kernel(
    x_ref,                    # (TB, S, D)  input features zero-padded to D
    t2v_ref,                  # (4, S)      [w_lin, b_lin, w_per, b_per]
    wqkv_ref,                 # (L, D, H*(2*d_k + d_v))   (Q cols pre-scaled by 1/sqrt(d_k))
    wo_ref,                   # (L, H*d_v, D)
    vecd_ref,                 # (L, 6, D)   [bo, ln1w, ln1b, b2, ln2w, ln2b]
    w1_ref, b1_ref,           # (L, D, ff), (L, 1, ff)
    w2_ref,                   # (L, ff, D)
    d1w_ref, d1b_ref,         # (S, D, H1), (1, H1)
    d2w_ref, d2b_ref,         # (H1, E),    (1, E)
    o_ref,                    # (TB, 1, E)
    *, n_heads, d_k, d_v, n_feat):
    f32 = jnp.float32
    TB, S, D = x_ref.shape
    n_layers = wqkv_ref.shape[0]
    hdk = n_heads * d_k
    hdv = n_heads * d_v

    # ---- Time2Vector + lane-dense feature concat ----
    x0 = x_ref[...]                                              # (TB, S, D)
    lane = jax.lax.broadcasted_iota(jnp.int32, (TB, S, D), 2)
    # mask the padded lanes explicitly (robust even if the pad is reused/nonzero)
    m = jnp.sum(jnp.where(lane < n_feat, x0, 0.0), axis=-1) * (1.0 / n_feat)  # (TB, S)
    t2v = t2v_ref[...]
    wl, bl = t2v[0:1, :], t2v[1:2, :]
    wp, bp = t2v[2:3, :], t2v[3:4, :]
    tl = wl * m + bl                                             # (TB, S)
    tp = jnp.sin(m * wp + bp)                                    # (TB, S)
    x = (x0
         + jnp.where(lane == n_feat, tl[..., None], 0.0)
         + jnp.where(lane == n_feat + 1, tp[..., None], 0.0))    # (TB, S, D)

    # batch folded into sublanes for all pointwise / projection work
    x2 = x.reshape(TB * S, D)                                    # (TB*S, D)

    for l in range(n_layers):                                    # static unroll (small L)
        vd = vecd_ref[l]                                         # (6, D)
        bo, ln1w, ln1b = vd[0:1, :], vd[1:2, :], vd[2:3, :]
        b2, ln2w, ln2b = vd[3:4, :], vd[4:5, :], vd[5:6, :]

        # --- fused QKV projection: one matmul for all heads (Q pre-scaled) ---
        qkv = jnp.dot(x2, wqkv_ref[l], preferred_element_type=f32)   # (TB*S, 2hdk+hdv)

        # --- attention: heads are independent ops (no cross-head dependency);
        #     their outputs are lane-concatenated and hit Wo with ONE matmul ---
        heads_out = []
        for h in range(n_heads):                                 # static unroll (small H)
            qh = qkv[:, h * d_k:(h + 1) * d_k].reshape(TB, S, d_k)
            kh = qkv[:, hdk + h * d_k:hdk + (h + 1) * d_k].reshape(TB, S, d_k)
            vh = qkv[:, 2 * hdk + h * d_v:2 * hdk + (h + 1) * d_v].reshape(TB, S, d_v)
            s = jnp.einsum('bqd,bkd->bqk', qh, kh,
                           preferred_element_type=f32)           # (TB, S, S)
            s = s - jnp.max(s, axis=-1, keepdims=True)
            p = jnp.exp(s)
            p = p * pl.reciprocal(jnp.sum(p, axis=-1, keepdims=True), approx=False)
            heads_out.append(jnp.einsum('bqk,bkd->bqd', p, vh,
                                        preferred_element_type=f32))  # (TB, S, d_v)
        oh = jnp.concatenate(heads_out, axis=-1).reshape(TB * S, hdv)  # lane concat
        mha = jnp.dot(oh, wo_ref[l], preferred_element_type=f32)       # (TB*S, D)

        # --- residual + LayerNorm 1 (eps=1e-6) ---
        h1 = x2 + mha + bo
        mu1 = jnp.mean(h1, axis=-1, keepdims=True)
        var1 = jnp.mean((h1 - mu1) ** 2, axis=-1, keepdims=True)
        ln1 = (h1 - mu1) * jax.lax.rsqrt(var1 + 1e-6) * ln1w + ln1b

        # --- feed-forward: Conv1d(k=1) == pointwise linear over the feature axis ---
        f = jnp.dot(ln1, w1_ref[l], preferred_element_type=f32) + b1_ref[l]
        f = jnp.maximum(f, 0.0)
        f = jnp.dot(f, w2_ref[l], preferred_element_type=f32) + b2
        f = jnp.maximum(f, 0.0)

        # --- residual + LayerNorm 2 ---
        h2 = ln1 + f
        mu2 = jnp.mean(h2, axis=-1, keepdims=True)
        var2 = jnp.mean((h2 - mu2) ** 2, axis=-1, keepdims=True)
        x2 = (h2 - mu2) * jax.lax.rsqrt(var2 + 1e-6) * ln2w + ln2b

    # --- head: flatten + dense_1 as S independent per-position matmuls,
    #     combined with a balanced tree-sum (breaks the serial add chain) ---
    x3 = x2.reshape(TB, S, D)
    parts = [jnp.dot(x3[:, s_idx, :], d1w_ref[s_idx], preferred_element_type=f32)
             for s_idx in range(S)]                              # each (TB, H1)
    while len(parts) > 1:
        nxt = [parts[i] + parts[i + 1] for i in range(0, len(parts) - 1, 2)]
        if len(parts) % 2:
            nxt.append(parts[-1])
        parts = nxt
    h = jnp.maximum(parts[0] + d1b_ref[...], 0.0)
    # dropout_1 / dropout_2 are identity at inference
    out = jnp.dot(h, d2w_ref[...], preferred_element_type=f32) + d2b_ref[...]
    o_ref[...] = out.reshape(TB, 1, out.shape[-1])


def transformer_forward(in_seq, packed, *, n_heads, d_k, d_v, input_shape,
                        encoding_dim, batch_block=1):
    B, S, F = in_seq.shape
    D = input_shape
    assert B % batch_block == 0
    # Layout plumbing: pad the feature axis to D so the two Time2Vector features
    # land lane-dense inside the kernel.
    x0 = jnp.pad(in_seq, ((0, 0), (0, 0), (0, D - F)))

    kernel = functools.partial(fused_transformer_kernel,
                               n_heads=n_heads, d_k=d_k, d_v=d_v, n_feat=F)

    weights = [packed["t2v"], packed["wqkv"], packed["wo"], packed["vecd"],
               packed["w1"], packed["b1"], packed["w2"],
               packed["d1w"], packed["d1b"], packed["d2w"], packed["d2b"]]

    def const_spec(arr):
        rank = arr.ndim
        return pl.BlockSpec(arr.shape, lambda b, _r=rank: (0,) * _r)

    tb = batch_block
    out = pl.pallas_call(
        kernel,
        out_shape=jax.ShapeDtypeStruct((B, 1, encoding_dim), jnp.float32),
        grid=(B // tb,),
        in_specs=[pl.BlockSpec((tb, S, D), lambda b: (b, 0, 0))]
                 + [const_spec(w) for w in weights],
        out_specs=pl.BlockSpec((tb, 1, encoding_dim), lambda b: (b, 0, 0)),
        # batch axis is parallel -> v7x's second TensorCore takes half the batch;
        # harmless (sequential) on single-TC v5e/v6e.  No vmem_limit override:
        # the resident footprint here is far below the default scoped limit.
        compiler_params=pltpu.CompilerParams(dimension_semantics=("parallel",)),
    )(x0, *weights)
    return out[:, 0, :]


# ----------------------------------------------------------------------------
# Parameter init (deterministic, synthetic) and packing for the fused kernel
# ----------------------------------------------------------------------------
def xavier(key, fan_in, fan_out, shape):
    bound = math.sqrt(6.0 / (fan_in + fan_out))
    return jax.random.uniform(key, shape, jnp.float32, -bound, bound)


def init_params(key, *, d_k, d_v, input_shape, n_heads, n_layers, ff_dim,
                seq_len, encoding_dim):
    D = input_shape
    keys = iter(jax.random.split(key, 16 + 16 * n_layers))
    params = {}

    # Time2Vector weights: uniform [0, 1), stored as (1, seq_len)
    params["t2v_wl"] = jax.random.uniform(next(keys), (1, seq_len), jnp.float32)
    params["t2v_bl"] = jax.random.uniform(next(keys), (1, seq_len), jnp.float32)
    params["t2v_wp"] = jax.random.uniform(next(keys), (1, seq_len), jnp.float32)
    params["t2v_bp"] = jax.random.uniform(next(keys), (1, seq_len), jnp.float32)

    layers = []
    for _ in range(n_layers):
        lp = {}
        # per-head Q/K/V projection weights, stored (H, D, d_k|d_v) (pre-transposed)
        lp["wq"] = jnp.stack([xavier(next(keys), D, d_k, (D, d_k)) for _ in range(n_heads)])
        lp["wk"] = jnp.stack([xavier(next(keys), D, d_k, (D, d_k)) for _ in range(n_heads)])
        lp["wv"] = jnp.stack([xavier(next(keys), D, d_v, (D, d_v)) for _ in range(n_heads)])
        # output projection (H*d_v -> D), bias zeros
        lp["wo"] = xavier(next(keys), n_heads * d_v, D, (n_heads * d_v, D))
        lp["bo"] = jnp.zeros((1, D), jnp.float32)
        # LayerNorms
        lp["ln1w"] = jnp.ones((1, D), jnp.float32)
        lp["ln1b"] = jnp.zeros((1, D), jnp.float32)
        lp["ln2w"] = jnp.ones((1, D), jnp.float32)
        lp["ln2b"] = jnp.zeros((1, D), jnp.float32)
        # Conv1d(k=1) layers as pointwise linears (stored (in, out))
        b1 = 1.0 / math.sqrt(D)
        lp["w1"] = jax.random.uniform(next(keys), (D, ff_dim), jnp.float32, -b1, b1)
        lp["b1"] = jax.random.uniform(next(keys), (1, ff_dim), jnp.float32, -b1, b1)
        b2 = 1.0 / math.sqrt(ff_dim)
        lp["w2"] = jax.random.uniform(next(keys), (ff_dim, D), jnp.float32, -b2, b2)
        lp["b2"] = jax.random.uniform(next(keys), (1, D), jnp.float32, -b2, b2)
        layers.append(lp)
    params["layers"] = layers

    # head
    flat = seq_len * D
    bd1 = 1.0 / math.sqrt(flat)
    params["d1_w"] = jax.random.uniform(next(keys), (flat, 64), jnp.float32, -bd1, bd1)
    params["d1_b"] = jax.random.uniform(next(keys), (1, 64), jnp.float32, -bd1, bd1)
    bd2 = 1.0 / math.sqrt(64)
    params["d2_w"] = jax.random.uniform(next(keys), (64, encoding_dim), jnp.float32, -bd2, bd2)
    params["d2_b"] = jax.random.uniform(next(keys), (1, encoding_dim), jnp.float32, -bd2, bd2)
    return params


def pack_params(params, *, seq_len, input_shape, d_k):
    """Host-side packing: stack per-layer weights, fuse Q/K/V columns (with the
    softmax scale folded into Q), and merge small vectors into a few arrays."""
    def cat_heads(w):                       # (H, D, d) -> (D, H*d), head-major columns
        return jnp.concatenate([w[h] for h in range(w.shape[0])], axis=1)

    layers = params["layers"]
    q_scale = 1.0 / math.sqrt(d_k)

    wqkv = jnp.stack([jnp.concatenate(
        [cat_heads(lp["wq"]) * q_scale, cat_heads(lp["wk"]), cat_heads(lp["wv"])],
        axis=1) for lp in layers])                                  # (L, D, H*(2dk+dv))
    vecd = jnp.stack([jnp.concatenate(
        [lp["bo"], lp["ln1w"], lp["ln1b"], lp["b2"], lp["ln2w"], lp["ln2b"]],
        axis=0) for lp in layers])                                  # (L, 6, D)

    return {
        "t2v": jnp.concatenate([params["t2v_wl"], params["t2v_bl"],
                                params["t2v_wp"], params["t2v_bp"]], axis=0),  # (4, S)
        "wqkv": wqkv,
        "wo":  jnp.stack([lp["wo"] for lp in layers]),
        "vecd": vecd,
        "w1":  jnp.stack([lp["w1"] for lp in layers]),
        "b1":  jnp.stack([lp["b1"] for lp in layers]),
        "w2":  jnp.stack([lp["w2"] for lp in layers]),
        # dense_1 weight reshaped (S*D, 64) -> (S, D, 64): row s*D+d -> [s, d, :]
        "d1w": params["d1_w"].reshape(seq_len, input_shape, params["d1_w"].shape[1]),
        "d1b": params["d1_b"],
        "d2w": params["d2_w"],
        "d2b": params["d2_b"],
    }


# ----------------------------------------------------------------------------
# Pure-JAX reference (same math) for the correctness check
# ----------------------------------------------------------------------------
def reference_forward(in_seq, params, *, n_heads, d_k):
    m = jnp.mean(in_seq, axis=-1)
    tl = params["t2v_wl"][0] * m + params["t2v_bl"][0]
    tp = jnp.sin(m * params["t2v_wp"][0] + params["t2v_bp"][0])
    x = jnp.concatenate([in_seq, tl[..., None], tp[..., None]], axis=-1)

    def ln(v, w, b):
        mu = jnp.mean(v, axis=-1, keepdims=True)
        var = jnp.mean((v - mu) ** 2, axis=-1, keepdims=True)
        return (v - mu) / jnp.sqrt(var + 1e-6) * w + b

    for lp in params["layers"]:
        heads = []
        for h in range(n_heads):
            q = x @ lp["wq"][h]
            k = x @ lp["wk"][h]
            v = x @ lp["wv"][h]
            s = jnp.einsum("bqd,bkd->bqk", q, k) / math.sqrt(d_k)
            p = jax.nn.softmax(s, axis=-1)
            heads.append(jnp.einsum("bqk,bkd->bqd", p, v))
        mha = jnp.concatenate(heads, axis=-1) @ lp["wo"] + lp["bo"][0]
        ln1 = ln(x + mha, lp["ln1w"][0], lp["ln1b"][0])
        f = jnp.maximum(ln1 @ lp["w1"] + lp["b1"][0], 0.0)
        f = jnp.maximum(f @ lp["w2"] + lp["b2"][0], 0.0)
        x = ln(ln1 + f, lp["ln2w"][0], lp["ln2b"][0])

    xf = x.reshape(x.shape[0], -1)
    h = jnp.maximum(xf @ params["d1_w"] + params["d1_b"][0], 0.0)
    return h @ params["d2_w"] + params["d2_b"][0]


# ----------------------------------------------------------------------------
if __name__ == "__main__":
    # Small, shape-consistent config: in_seq (B, seq_len, features), D = features + 2
    B, seq_len, features = 2, 8, 30
    d_k = d_v = 16
    input_shape = features + 2          # 32
    n_heads = 2
    n_layers = 2
    ff_dim = 64
    encoding_dim = 16

    key = jax.random.PRNGKey(0)
    k_in, k_par = jax.random.split(key)
    in_seq = jax.random.normal(k_in, (B, seq_len, features), jnp.float32)

    params = init_params(k_par, d_k=d_k, d_v=d_v, input_shape=input_shape,
                         n_heads=n_heads, n_layers=n_layers, ff_dim=ff_dim,
                         seq_len=seq_len, encoding_dim=encoding_dim)
    packed = pack_params(params, seq_len=seq_len, input_shape=input_shape, d_k=d_k)

    out = transformer_forward(in_seq, packed, n_heads=n_heads, d_k=d_k, d_v=d_v,
                              input_shape=input_shape, encoding_dim=encoding_dim,
                              batch_block=1)
    out = jax.block_until_ready(out)
    assert out.shape == (B, encoding_dim), out.shape

    ref = reference_forward(in_seq, params, n_heads=n_heads, d_k=d_k)
    ref = jax.block_until_ready(ref)
    assert jnp.allclose(out, ref, rtol=2e-3, atol=2e-3), (
        float(jnp.max(jnp.abs(out - ref))))

    print("KERNEL_OK")
</pallas_src>

<mosaic_0001>
module attributes {stable_mosaic.version = 11 : i64} {
  func.func @fused_transformer_kernel(%arg0: i32, %arg1: memref<1x8x32xf32, #tpu.memory_space<vmem>>, %arg2: memref<4x8xf32, #tpu.memory_space<vmem>>, %arg3: memref<2x32x96xf32, #tpu.memory_space<vmem>>, %arg4: memref<2x32x32xf32, #tpu.memory_space<vmem>>, %arg5: memref<2x6x32xf32, #tpu.memory_space<vmem>>, %arg6: memref<2x32x64xf32, #tpu.memory_space<vmem>>, %arg7: memref<2x1x64xf32, #tpu.memory_space<vmem>>, %arg8: memref<2x64x32xf32, #tpu.memory_space<vmem>>, %arg9: memref<8x32x64xf32, #tpu.memory_space<vmem>>, %arg10: memref<1x64xf32, #tpu.memory_space<vmem>>, %arg11: memref<64x16xf32, #tpu.memory_space<vmem>>, %arg12: memref<1x16xf32, #tpu.memory_space<vmem>>, %arg13: memref<1x1x16xf32, #tpu.memory_space<vmem>>) attributes {dimension_semantics = [#tpu.dimension_semantics<parallel>], iteration_bounds = array<i64: 2>, scalar_prefetch = 0 : i64, scratch_operands = 0 : i64, tpu.core_type = #tpu.core_type<tc>, window_params = [{transform_indices = @transform_0, window_bounds = array<i64: 1, 8, 32>}, {pipeline_mode = #tpu.pipeline_mode<synchronous>, transform_indices = @transform_1, window_bounds = array<i64: 4, 8>}, {pipeline_mode = #tpu.pipeline_mode<synchronous>, transform_indices = @transform_2, window_bounds = array<i64: 2, 32, 96>}, {pipeline_mode = #tpu.pipeline_mode<synchronous>, transform_indices = @transform_3, window_bounds = array<i64: 2, 32, 32>}, {pipeline_mode = #tpu.pipeline_mode<synchronous>, transform_indices = @transform_4, window_bounds = array<i64: 2, 6, 32>}, {pipeline_mode = #tpu.pipeline_mode<synchronous>, transform_indices = @transform_5, window_bounds = array<i64: 2, 32, 64>}, {pipeline_mode = #tpu.pipeline_mode<synchronous>, transform_indices = @transform_6, window_bounds = array<i64: 2, 1, 64>}, {pipeline_mode = #tpu.pipeline_mode<synchronous>, transform_indices = @transform_7, window_bounds = array<i64: 2, 64, 32>}, {pipeline_mode = #tpu.pipeline_mode<synchronous>, transform_indices = @transform_8, window_bounds = array<i64: 8, 32, 64>}, {pipeline_mode = #tpu.pipeline_mode<synchronous>, transform_indices = @transform_9, window_bounds = array<i64: 1, 64>}, {pipeline_mode = #tpu.pipeline_mode<synchronous>, transform_indices = @transform_10, window_bounds = array<i64: 64, 16>}, {pipeline_mode = #tpu.pipeline_mode<synchronous>, transform_indices = @transform_11, window_bounds = array<i64: 1, 16>}, {transform_indices = @transform_12, window_bounds = array<i64: 1, 1, 16>}]} {
    %c0 = arith.constant 0 : index
    %c0_0 = arith.constant 0 : index
    %c0_1 = arith.constant 0 : index
    %0 = vector.load %arg1[%c0, %c0_0, %c0_1] : memref<1x8x32xf32, #tpu.memory_space<vmem>>, vector<1x8x32xf32>
    %1 = tpu.iota {dimensions = array<i32: 2>} : vector<1x8x32xi32>
    %c30_i32 = arith.constant 30 : i32
    %2 = vector.broadcast %c30_i32 : i32 to vector<1x8x32xi32>
    %3 = arith.cmpi slt, %1, %2 : vector<1x8x32xi32>
    %cst = arith.constant 0.000000e+00 : f32
    %4 = vector.broadcast %cst : f32 to vector<1x8x32xf32>
    %5 = arith.select %3, %0, %4 : vector<1x8x32xi1>, vector<1x8x32xf32>
    %cst_2 = arith.constant dense<0.000000e+00> : vector<1x8xf32>
    %6 = vector.multi_reduction <add>, %5, %cst_2 [2] : vector<1x8x32xf32> to vector<1x8xf32>
    %cst_3 = arith.constant 0.0333333351 : f32
    %7 = vector.broadcast %cst_3 : f32 to vector<1x8xf32>
    %8 = arith.mulf %6, %7 : vector<1x8xf32>
    %c0_4 = arith.constant 0 : index
    %c0_5 = arith.constant 0 : index
    %9 = vector.load %arg2[%c0_4, %c0_5] : memref<4x8xf32, #tpu.memory_space<vmem>>, vector<4x8xf32>
    %10 = vector.extract_strided_slice %9 {offsets = [0, 0], sizes = [1, 8], strides = [1, 1]} : vector<4x8xf32> to vector<1x8xf32>
    %11 = vector.extract_strided_slice %9 {offsets = [1, 0], sizes = [1, 8], strides = [1, 1]} : vector<4x8xf32> to vector<1x8xf32>
    %12 = vector.extract_strided_slice %9 {offsets = [2, 0], sizes = [1, 8], strides = [1, 1]} : vector<4x8xf32> to vector<1x8xf32>
    %13 = vector.extract_strided_slice %9 {offsets = [3, 0], sizes = [1, 8], strides = [1, 1]} : vector<4x8xf32> to vector<1x8xf32>
    %14 = arith.mulf %10, %8 : vector<1x8xf32>
    %15 = arith.addf %14, %11 : vector<1x8xf32>
    %16 = arith.mulf %8, %12 : vector<1x8xf32>
    %17 = arith.addf %16, %13 : vector<1x8xf32>
    %18 = math.sin %17 : vector<1x8xf32>
    %c30_i32_6 = arith.constant 30 : i32
    %19 = vector.broadcast %c30_i32_6 : i32 to vector<1x8x32xi32>
    %20 = arith.cmpi eq, %1, %19 : vector<1x8x32xi32>
    %21 = vector.shape_cast %15 : vector<1x8xf32> to vector<1x8x1xf32>
    %cst_7 = arith.constant 0.000000e+00 : f32
    %22 = vector.shape_cast %21 : vector<1x8x1xf32> to vector<1x8x1xf32>
    %23 = vector.broadcast %22 : vector<1x8x1xf32> to vector<1x8x32xf32>
    %24 = vector.broadcast %cst_7 : f32 to vector<1x8x32xf32>
    %25 = arith.select %20, %23, %24 : vector<1x8x32xi1>, vector<1x8x32xf32>
    %26 = arith.addf %0, %25 : vector<1x8x32xf32>
    %c31_i32 = arith.constant 31 : i32
    %27 = vector.broadcast %c31_i32 : i32 to vector<1x8x32xi32>
    %28 = arith.cmpi eq, %1, %27 : vector<1x8x32xi32>
    %29 = vector.shape_cast %18 : vector<1x8xf32> to vector<1x8x1xf32>
    %cst_8 = arith.constant 0.000000e+00 : f32
    %30 = vector.shape_cast %29 : vector<1x8x1xf32> to vector<1x8x1xf32>
    %31 = vector.broadcast %30 : vector<1x8x1xf32> to vector<1x8x32xf32>
    %32 = vector.broadcast %cst_8 : f32 to vector<1x8x32xf32>
    %33 = arith.select %28, %31, %32 : vector<1x8x32xi1>, vector<1x8x32xf32>
    %34 = arith.addf %26, %33 : vector<1x8x32xf32>
    %35 = vector.shape_cast %34 : vector<1x8x32xf32> to vector<8x32xf32>
    %c0_9 = arith.constant 0 : index
    %c0_10 = arith.constant 0 : index
    %c0_11 = arith.constant 0 : index
    %36 = vector.load %arg5[%c0_9, %c0_10, %c0_11] : memref<2x6x32xf32, #tpu.memory_space<vmem>>, vector<1x6x32xf32>
    %37 = vector.shape_cast %36 : vector<1x6x32xf32> to vector<6x32xf32>
    %38 = vector.extract_strided_slice %37 {offsets = [0, 0], sizes = [1, 32], strides = [1, 1]} : vector<6x32xf32> to vector<1x32xf32>
    %39 = vector.extract_strided_slice %37 {offsets = [1, 0], sizes = [1, 32], strides = [1, 1]} : vector<6x32xf32> to vector<1x32xf32>
    %40 = vector.extract_strided_slice %37 {offsets = [2, 0], sizes = [1, 32], strides = [1, 1]} : vector<6x32xf32> to vector<1x32xf32>
    %41 = vector.extract_strided_slice %37 {offsets = [3, 0], sizes = [1, 32], strides = [1, 1]} : vector<6x32xf32> to vector<1x32xf32>
    %42 = vector.extract_strided_slice %37 {offsets = [4, 0], sizes = [1, 32], strides = [1, 1]} : vector<6x32xf32> to vector<1x32xf32>
    %43 = vector.extract_strided_slice %37 {offsets = [5, 0], sizes = [1, 32], strides = [1, 1]} : vector<6x32xf32> to vector<1x32xf32>
    %c0_12 = arith.constant 0 : index
    %c0_13 = arith.constant 0 : index
    %c0_14 = arith.constant 0 : index
    %44 = vector.load %arg3[%c0_12, %c0_13, %c0_14] : memref<2x32x96xf32, #tpu.memory_space<vmem>>, vector<1x32x96xf32>
    %45 = vector.shape_cast %44 : vector<1x32x96xf32> to vector<32x96xf32>
    %cst_15 = arith.constant dense<0.000000e+00> : vector<8x96xf32>
    %46 = tpu.matmul %35, %45, %cst_15 {dimension_numbers = #tpu.dot_dimension_numbers<[1], [0], [0], [1], [0, 0, 1, 1], [], []>} : vector<8x32xf32>, vector<32x96xf32>, vector<8x96xf32> -> vector<8x96xf32>
    %47 = vector.extract_strided_slice %46 {offsets = [0, 0], sizes = [8, 16], strides = [1, 1]} : vector<8x96xf32> to vector<8x16xf32>
    %48 = vector.shape_cast %47 : vector<8x16xf32> to vector<1x8x16xf32>
    %49 = vector.extract_strided_slice %46 {offsets = [0, 32], sizes = [8, 16], strides = [1, 1]} : vector<8x96xf32> to vector<8x16xf32>
    %50 = vector.shape_cast %49 : vector<8x16xf32> to vector<1x8x16xf32>
    %51 = vector.extract_strided_slice %46 {offsets = [0, 64], sizes = [8, 16], strides = [1, 1]} : vector<8x96xf32> to vector<8x16xf32>
    %52 = vector.shape_cast %51 : vector<8x16xf32> to vector<1x8x16xf32>
    "tpu.trace_start"() <{level = 10 : i32, message = "bqd,bkd->bqk"}> : () -> ()
    %cst_16 = arith.constant dense<0.000000e+00> : vector<1x8x8xf32>
    %53 = tpu.matmul %48, %50, %cst_16 {dimension_numbers = #tpu.dot_dimension_numbers<[2], [2], [1], [1], [0, 0, 0, 1, 1, 1], [0], [0]>} : vector<1x8x16xf32>, vector<1x8x16xf32>, vector<1x8x8xf32> -> vector<1x8x8xf32>
    "tpu.trace_stop"() : () -> ()
    %cst_17 = arith.constant dense<0xFF800000> : vector<1x8xf32>
    %54 = vector.multi_reduction <maximumf>, %53, %cst_17 [2] : vector<1x8x8xf32> to vector<1x8xf32>
    %55 = vector.shape_cast %54 : vector<1x8xf32> to vector<1x8x1xf32>
    %56 = vector.broadcast %55 : vector<1x8x1xf32> to vector<1x8x8xf32>
    %57 = arith.subf %53, %56 : vector<1x8x8xf32>
    %58 = math.exp %57 : vector<1x8x8xf32>
    %cst_18 = arith.constant dense<0.000000e+00> : vector<1x8xf32>
    %59 = vector.multi_reduction <add>, %58, %cst_18 [2] : vector<1x8x8xf32> to vector<1x8xf32>
    %60 = vector.shape_cast %59 : vector<1x8xf32> to vector<1x8x1xf32>
    %61 = tpu.reciprocal %60 : vector<1x8x1xf32> -> vector<1x8x1xf32>
    %62 = vector.broadcast %61 : vector<1x8x1xf32> to vector<1x8x8xf32>
    %63 = arith.mulf %58, %62 : vector<1x8x8xf32>
    "tpu.trace_start"() <{level = 10 : i32, message = "bqk,bkd->bqd"}> : () -> ()
    %cst_19 = arith.constant dense<0.000000e+00> : vector<1x8x16xf32>
    %64 = tpu.matmul %63, %52, %cst_19 {dimension_numbers = #tpu.dot_dimension_numbers<[2], [1], [1], [2], [0, 0, 0, 1, 1, 2], [0], [0]>} : vector<1x8x8xf32>, vector<1x8x16xf32>, vector<1x8x16xf32> -> vector<1x8x16xf32>
    "tpu.trace_stop"() : () -> ()
    %65 = vector.extract_strided_slice %46 {offsets = [0, 16], sizes = [8, 16], strides = [1, 1]} : vector<8x96xf32> to vector<8x16xf32>
    %66 = vector.shape_cast %65 : vector<8x16xf32> to vector<1x8x16xf32>
    %67 = vector.extract_strided_slice %46 {offsets = [0, 48], sizes = [8, 16], strides = [1, 1]} : vector<8x96xf32> to vector<8x16xf32>
    %68 = vector.shape_cast %67 : vector<8x16xf32> to vector<1x8x16xf32>
    %69 = vector.extract_strided_slice %46 {offsets = [0, 80], sizes = [8, 16], strides = [1, 1]} : vector<8x96xf32> to vector<8x16xf32>
    %70 = vector.shape_cast %69 : vector<8x16xf32> to vector<1x8x16xf32>
    "tpu.trace_start"() <{level = 10 : i32, message = "bqd,bkd->bqk"}> : () -> ()
    %cst_20 = arith.constant dense<0.000000e+00> : vector<1x8x8xf32>
    %71 = tpu.matmul %66, %68, %cst_20 {dimension_numbers = #tpu.dot_dimension_numbers<[2], [2], [1], [1], [0, 0, 0, 1, 1, 1], [0], [0]>} : vector<1x8x16xf32>, vector<1x8x16xf32>, vector<1x8x8xf32> -> vector<1x8x8xf32>
    "tpu.trace_stop"() : () -> ()
    %cst_21 = arith.constant dense<0xFF800000> : vector<1x8xf32>
    %72 = vector.multi_reduction <maximumf>, %71, %cst_21 [2] : vector<1x8x8xf32> to vector<1x8xf32>
    %73 = vector.shape_cast %72 : vector<1x8xf32> to vector<1x8x1xf32>
    %74 = vector.broadcast %73 : vector<1x8x1xf32> to vector<1x8x8xf32>
    %75 = arith.subf %71, %74 : vector<1x8x8xf32>
    %76 = math.exp %75 : vector<1x8x8xf32>
    %cst_22 = arith.constant dense<0.000000e+00> : vector<1x8xf32>
    %77 = vector.multi_reduction <add>, %76, %cst_22 [2] : vector<1x8x8xf32> to vector<1x8xf32>
    %78 = vector.shape_cast %77 : vector<1x8xf32> to vector<1x8x1xf32>
    %79 = tpu.reciprocal %78 : vector<1x8x1xf32> -> vector<1x8x1xf32>
    %80 = vector.broadcast %79 : vector<1x8x1xf32> to vector<1x8x8xf32>
    %81 = arith.mulf %76, %80 : vector<1x8x8xf32>
    "tpu.trace_start"() <{level = 10 : i32, message = "bqk,bkd->bqd"}> : () -> ()
    %cst_23 = arith.constant dense<0.000000e+00> : vector<1x8x16xf32>
    %82 = tpu.matmul %81, %70, %cst_23 {dimension_numbers = #tpu.dot_dimension_numbers<[2], [1], [1], [2], [0, 0, 0, 1, 1, 2], [0], [0]>} : vector<1x8x8xf32>, vector<1x8x16xf32>, vector<1x8x16xf32> -> vector<1x8x16xf32>
    "tpu.trace_stop"() : () -> ()
    %83 = tpu.concatenate %64, %82 in 2 : vector<1x8x16xf32>, vector<1x8x16xf32> -> vector<1x8x32xf32>
    %84 = vector.shape_cast %83 : vector<1x8x32xf32> to vector<8x32xf32>
    %c0_24 = arith.constant 0 : index
    %c0_25 = arith.constant 0 : index
    %c0_26 = arith.constant 0 : index
    %85 = vector.load %arg4[%c0_24, %c0_25, %c0_26] : memref<2x32x32xf32, #tpu.memory_space<vmem>>, vector<1x32x32xf32>
    %86 = vector.shape_cast %85 : vector<1x32x32xf32> to vector<32x32xf32>
    %cst_27 = arith.constant dense<0.000000e+00> : vector<8x32xf32>
    %87 = tpu.matmul %84, %86, %cst_27 {dimension_numbers = #tpu.dot_dimension_numbers<[1], [0], [0], [1], [0, 0, 1, 1], [], []>} : vector<8x32xf32>, vector<32x32xf32>, vector<8x32xf32> -> vector<8x32xf32>
    %88 = arith.addf %35, %87 : vector<8x32xf32>
    %89 = vector.broadcast %38 : vector<1x32xf32> to vector<8x32xf32>
    %90 = arith.addf %88, %89 : vector<8x32xf32>
    %cst_28 = arith.constant dense<0.000000e+00> : vector<8xf32>
    %91 = vector.multi_reduction <add>, %90, %cst_28 [1] : vector<8x32xf32> to vector<8xf32>
    %92 = vector.shape_cast %91 : vector<8xf32> to vector<8x1xf32>
    %cst_29 = arith.constant 3.200000e+01 : f32
    %93 = vector.broadcast %cst_29 : f32 to vector<8x1xf32>
    %94 = arith.divf %92, %93 : vector<8x1xf32>
    %95 = vector.broadcast %94 : vector<8x1xf32> to vector<8x32xf32>
    %96 = arith.subf %90, %95 : vector<8x32xf32>
    %97 = arith.mulf %96, %96 : vector<8x32xf32>
    %cst_30 = arith.constant dense<0.000000e+00> : vector<8xf32>
    %98 = vector.multi_reduction <add>, %97, %cst_30 [1] : vector<8x32xf32> to vector<8xf32>
    %99 = vector.shape_cast %98 : vector<8xf32> to vector<8x1xf32>
    %cst_31 = arith.constant 3.200000e+01 : f32
    %100 = vector.broadcast %cst_31 : f32 to vector<8x1xf32>
    %101 = arith.divf %99, %100 : vector<8x1xf32>
    %102 = vector.broadcast %94 : vector<8x1xf32> to vector<8x32xf32>
    %103 = arith.subf %90, %102 : vector<8x32xf32>
    %cst_32 = arith.constant 9.99999997E-7 : f32
    %104 = vector.broadcast %cst_32 : f32 to vector<8x1xf32>
    %105 = arith.addf %101, %104 : vector<8x1xf32>
    %106 = math.rsqrt %105 : vector<8x1xf32>
    %107 = vector.broadcast %106 : vector<8x1xf32> to vector<8x32xf32>
    %108 = arith.mulf %103, %107 : vector<8x32xf32>
    %109 = vector.broadcast %39 : vector<1x32xf32> to vector<8x32xf32>
    %110 = arith.mulf %108, %109 : vector<8x32xf32>
    %111 = vector.broadcast %40 : vector<1x32xf32> to vector<8x32xf32>
    %112 = arith.addf %110, %111 : vector<8x32xf32>
    %c0_33 = arith.constant 0 : index
    %c0_34 = arith.constant 0 : index
    %c0_35 = arith.constant 0 : index
    %113 = vector.load %arg6[%c0_33, %c0_34, %c0_35] : memref<2x32x64xf32, #tpu.memory_space<vmem>>, vector<1x32x64xf32>
    %114 = vector.shape_cast %113 : vector<1x32x64xf32> to vector<32x64xf32>
    %cst_36 = arith.constant dense<0.000000e+00> : vector<8x64xf32>
    %115 = tpu.matmul %112, %114, %cst_36 {dimension_numbers = #tpu.dot_dimension_numbers<[1], [0], [0], [1], [0, 0, 1, 1], [], []>} : vector<8x32xf32>, vector<32x64xf32>, vector<8x64xf32> -> vector<8x64xf32>
    %c0_37 = arith.constant 0 : index
    %c0_38 = arith.constant 0 : index
    %c0_39 = arith.constant 0 : index
    %116 = vector.load %arg7[%c0_37, %c0_38, %c0_39] : memref<2x1x64xf32, #tpu.memory_space<vmem>>, vector<1x1x64xf32>
    %117 = vector.shape_cast %116 : vector<1x1x64xf32> to vector<1x64xf32>
    %118 = vector.broadcast %117 : vector<1x64xf32> to vector<8x64xf32>
    %119 = arith.addf %115, %118 : vector<8x64xf32>
    %cst_40 = arith.constant 0.000000e+00 : f32
    %120 = vector.broadcast %cst_40 : f32 to vector<8x64xf32>
    %121 = arith.maximumf %119, %120 : vector<8x64xf32>
    %c0_41 = arith.constant 0 : index
    %c0_42 = arith.constant 0 : index
    %c0_43 = arith.constant 0 : index
    %122 = vector.load %arg8[%c0_41, %c0_42, %c0_43] : memref<2x64x32xf32, #tpu.memory_space<vmem>>, vector<1x64x32xf32>
    %123 = vector.shape_cast %122 : vector<1x64x32xf32> to vector<64x32xf32>
    %cst_44 = arith.constant dense<0.000000e+00> : vector<8x32xf32>
    %124 = tpu.matmul %121, %123, %cst_44 {dimension_numbers = #tpu.dot_dimension_numbers<[1], [0], [0], [1], [0, 0, 1, 1], [], []>} : vector<8x64xf32>, vector<64x32xf32>, vector<8x32xf32> -> vector<8x32xf32>
    %125 = vector.broadcast %41 : vector<1x32xf32> to vector<8x32xf32>
    %126 = arith.addf %124, %125 : vector<8x32xf32>
    %cst_45 = arith.constant 0.000000e+00 : f32
    %127 = vector.broadcast %cst_45 : f32 to vector<8x32xf32>
    %128 = arith.maximumf %126, %127 : vector<8x32xf32>
    %129 = arith.addf %112, %128 : vector<8x32xf32>
    %cst_46 = arith.constant dense<0.000000e+00> : vector<8xf32>
    %130 = vector.multi_reduction <add>, %129, %cst_46 [1] : vector<8x32xf32> to vector<8xf32>
    %131 = vector.shape_cast %130 : vector<8xf32> to vector<8x1xf32>
    %cst_47 = arith.constant 3.200000e+01 : f32
    %132 = vector.broadcast %cst_47 : f32 to vector<8x1xf32>
    %133 = arith.divf %131, %132 : vector<8x1xf32>
    %134 = vector.broadcast %133 : vector<8x1xf32> to vector<8x32xf32>
    %135 = arith.subf %129, %134 : vector<8x32xf32>
    %136 = arith.mulf %135, %135 : vector<8x32xf32>
    %cst_48 = arith.constant dense<0.000000e+00> : vector<8xf32>
    %137 = vector.multi_reduction <add>, %136, %cst_48 [1] : vector<8x32xf32> to vector<8xf32>
    %138 = vector.shape_cast %137 : vector<8xf32> to vector<8x1xf32>
    %cst_49 = arith.constant 3.200000e+01 : f32
    %139 = vector.broadcast %cst_49 : f32 to vector<8x1xf32>
    %140 = arith.divf %138, %139 : vector<8x1xf32>
    %141 = vector.broadcast %133 : vector<8x1xf32> to vector<8x32xf32>
    %142 = arith.subf %129, %141 : vector<8x32xf32>
    %cst_50 = arith.constant 9.99999997E-7 : f32
    %143 = vector.broadcast %cst_50 : f32 to vector<8x1xf32>
    %144 = arith.addf %140, %143 : vector<8x1xf32>
    %145 = math.rsqrt %144 : vector<8x1xf32>
    %146 = vector.broadcast %145 : vector<8x1xf32> to vector<8x32xf32>
    %147 = arith.mulf %142, %146 : vector<8x32xf32>
    %148 = vector.broadcast %42 : vector<1x32xf32> to vector<8x32xf32>
    %149 = arith.mulf %147, %148 : vector<8x32xf32>
    %150 = vector.broadcast %43 : vector<1x32xf32> to vector<8x32xf32>
    %151 = arith.addf %149, %150 : vector<8x32xf32>
    %c1 = arith.constant 1 : index
    %c0_51 = arith.constant 0 : index
    %c0_52 = arith.constant 0 : index
    %152 = vector.load %arg5[%c1, %c0_51, %c0_52] : memref<2x6x32xf32, #tpu.memory_space<vmem>>, vector<1x6x32xf32>
    %153 = vector.shape_cast %152 : vector<1x6x32xf32> to vector<6x32xf32>
    %154 = vector.extract_strided_slice %153 {offsets = [0, 0], sizes = [1, 32], strides = [1, 1]} : vector<6x32xf32> to vector<1x32xf32>
    %155 = vector.extract_strided_slice %153 {offsets = [1, 0], sizes = [1, 32], strides = [1, 1]} : vector<6x32xf32> to vector<1x32xf32>
    %156 = vector.extract_strided_slice %153 {offsets = [2, 0], sizes = [1, 32], strides = [1, 1]} : vector<6x32xf32> to vector<1x32xf32>
    %157 = vector.extract_strided_slice %153 {offsets = [3, 0], sizes = [1, 32], strides = [1, 1]} : vector<6x32xf32> to vector<1x32xf32>
    %158 = vector.extract_strided_slice %153 {offsets = [4, 0], sizes = [1, 32], strides = [1, 1]} : vector<6x32xf32> to vector<1x32xf32>
    %159 = vector.extract_strided_slice %153 {offsets = [5, 0], sizes = [1, 32], strides = [1, 1]} : vector<6x32xf32> to vector<1x32xf32>
    %c1_53 = arith.constant 1 : index
    %c0_54 = arith.constant 0 : index
    %c0_55 = arith.constant 0 : index
    %160 = vector.load %arg3[%c1_53, %c0_54, %c0_55] : memref<2x32x96xf32, #tpu.memory_space<vmem>>, vector<1x32x96xf32>
    %161 = vector.shape_cast %160 : vector<1x32x96xf32> to vector<32x96xf32>
    %cst_56 = arith.constant dense<0.000000e+00> : vector<8x96xf32>
    %162 = tpu.matmul %151, %161, %cst_56 {dimension_numbers = #tpu.dot_dimension_numbers<[1], [0], [0], [1], [0, 0, 1, 1], [], []>} : vector<8x32xf32>, vector<32x96xf32>, vector<8x96xf32> -> vector<8x96xf32>
    %163 = vector.extract_strided_slice %162 {offsets = [0, 0], sizes = [8, 16], strides = [1, 1]} : vector<8x96xf32> to vector<8x16xf32>
    %164 = vector.shape_cast %163 : vector<8x16xf32> to vector<1x8x16xf32>
    %165 = vector.extract_strided_slice %162 {offsets = [0, 32], sizes = [8, 16], strides = [1, 1]} : vector<8x96xf32> to vector<8x16xf32>
    %166 = vector.shape_cast %165 : vector<8x16xf32> to vector<1x8x16xf32>
    %167 = vector.extract_strided_slice %162 {offsets = [0, 64], sizes = [8, 16], strides = [1, 1]} : vector<8x96xf32> to vector<8x16xf32>
    %168 = vector.shape_cast %167 : vector<8x16xf32> to vector<1x8x16xf32>
    "tpu.trace_start"() <{level = 10 : i32, message = "bqd,bkd->bqk"}> : () -> ()
    %cst_57 = arith.constant dense<0.000000e+00> : vector<1x8x8xf32>
    %169 = tpu.matmul %164, %166, %cst_57 {dimension_numbers = #tpu.dot_dimension_numbers<[2], [2], [1], [1], [0, 0, 0, 1, 1, 1], [0], [0]>} : vector<1x8x16xf32>, vector<1x8x16xf32>, vector<1x8x8xf32> -> vector<1x8x8xf32>
    "tpu.trace_stop"() : () -> ()
    %cst_58 = arith.constant dense<0xFF800000> : vector<1x8xf32>
    %170 = vector.multi_reduction <maximumf>, %169, %cst_58 [2] : vector<1x8x8xf32> to vector<1x8xf32>
    %171 = vector.shape_cast %170 : vector<1x8xf32> to vector<1x8x1xf32>
    %172 = vector.broadcast %171 : vector<1x8x1xf32> to vector<1x8x8xf32>
    %173 = arith.subf %169, %172 : vector<1x8x8xf32>
    %174 = math.exp %173 : vector<1x8x8xf32>
    %cst_59 = arith.constant dense<0.000000e+00> : vector<1x8xf32>
    %175 = vector.multi_reduction <add>, %174, %cst_59 [2] : vector<1x8x8xf32> to vector<1x8xf32>
    %176 = vector.shape_cast %175 : vector<1x8xf32> to vector<1x8x1xf32>
    %177 = tpu.reciprocal %176 : vector<1x8x1xf32> -> vector<1x8x1xf32>
    %178 = vector.broadcast %177 : vector<1x8x1xf32> to vector<1x8x8xf32>
    %179 = arith.mulf %174, %178 : vector<1x8x8xf32>
    "tpu.trace_start"() <{level = 10 : i32, message = "bqk,bkd->bqd"}> : () -> ()
    %cst_60 = arith.constant dense<0.000000e+00> : vector<1x8x16xf32>
    %180 = tpu.matmul %179, %168, %cst_60 {dimension_numbers = #tpu.dot_dimension_numbers<[2], [1], [1], [2], [0, 0, 0, 1, 1, 2], [0], [0]>} : vector<1x8x8xf32>, vector<1x8x16xf32>, vector<1x8x16xf32> -> vector<1x8x16xf32>
    "tpu.trace_stop"() : () -> ()
    %181 = vector.extract_strided_slice %162 {offsets = [0, 16], sizes = [8, 16], strides = [1, 1]} : vector<8x96xf32> to vector<8x16xf32>
    %182 = vector.shape_cast %181 : vector<8x16xf32> to vector<1x8x16xf32>
    %183 = vector.extract_strided_slice %162 {offsets = [0, 48], sizes = [8, 16], strides = [1, 1]} : vector<8x96xf32> to vector<8x16xf32>
    %184 = vector.shape_cast %183 : vector<8x16xf32> to vector<1x8x16xf32>
    %185 = vector.extract_strided_slice %162 {offsets = [0, 80], sizes = [8, 16], strides = [1, 1]} : vector<8x96xf32> to vector<8x16xf32>
    %186 = vector.shape_cast %185 : vector<8x16xf32> to vector<1x8x16xf32>
    "tpu.trace_start"() <{level = 10 : i32, message = "bqd,bkd->bqk"}> : () -> ()
    %cst_61 = arith.constant dense<0.000000e+00> : vector<1x8x8xf32>
    %187 = tpu.matmul %182, %184, %cst_61 {dimension_numbers = #tpu.dot_dimension_numbers<[2], [2], [1], [1], [0, 0, 0, 1, 1, 1], [0], [0]>} : vector<1x8x16xf32>, vector<1x8x16xf32>, vector<1x8x8xf32> -> vector<1x8x8xf32>
    "tpu.trace_stop"() : () -> ()
    %cst_62 = arith.constant dense<0xFF800000> : vector<1x8xf32>
    %188 = vector.multi_reduction <maximumf>, %187, %cst_62 [2] : vector<1x8x8xf32> to vector<1x8xf32>
    %189 = vector.shape_cast %188 : vector<1x8xf32> to vector<1x8x1xf32>
    %190 = vector.broadcast %189 : vector<1x8x1xf32> to vector<1x8x8xf32>
    %191 = arith.subf %187, %190 : vector<1x8x8xf32>
    %192 = math.exp %191 : vector<1x8x8xf32>
    %cst_63 = arith.constant dense<0.000000e+00> : vector<1x8xf32>
    %193 = vector.multi_reduction <add>, %192, %cst_63 [2] : vector<1x8x8xf32> to vector<1x8xf32>
    %194 = vector.shape_cast %193 : vector<1x8xf32> to vector<1x8x1xf32>
    %195 = tpu.reciprocal %194 : vector<1x8x1xf32> -> vector<1x8x1xf32>
    %196 = vector.broadcast %195 : vector<1x8x1xf32> to vector<1x8x8xf32>
    %197 = arith.mulf %192, %196 : vector<1x8x8xf32>
    "tpu.trace_start"() <{level = 10 : i32, message = "bqk,bkd->bqd"}> : () -> ()
    %cst_64 = arith.constant dense<0.000000e+00> : vector<1x8x16xf32>
    %198 = tpu.matmul %197, %186, %cst_64 {dimension_numbers = #tpu.dot_dimension_numbers<[2], [1], [1], [2], [0, 0, 0, 1, 1, 2], [0], [0]>} : vector<1x8x8xf32>, vector<1x8x16xf32>, vector<1x8x16xf32> -> vector<1x8x16xf32>
    "tpu.trace_stop"() : () -> ()
    %199 = tpu.concatenate %180, %198 in 2 : vector<1x8x16xf32>, vector<1x8x16xf32> -> vector<1x8x32xf32>
    %200 = vector.shape_cast %199 : vector<1x8x32xf32> to vector<8x32xf32>
    %c1_65 = arith.constant 1 : index
    %c0_66 = arith.constant 0 : index
    %c0_67 = arith.constant 0 : index
    %201 = vector.load %arg4[%c1_65, %c0_66, %c0_67] : memref<2x32x32xf32, #tpu.memory_space<vmem>>, vector<1x32x32xf32>
    %202 = vector.shape_cast %201 : vector<1x32x32xf32> to vector<32x32xf32>
    %cst_68 = arith.constant dense<0.000000e+00> : vector<8x32xf32>
    %203 = tpu.matmul %200, %202, %cst_68 {dimension_numbers = #tpu.dot_dimension_numbers<[1], [0], [0], [1], [0, 0, 1, 1], [], []>} : vector<8x32xf32>, vector<32x32xf32>, vector<8x32xf32> -> vector<8x32xf32>
    %204 = arith.addf %151, %203 : vector<8x32xf32>
    %205 = vector.broadcast %154 : vector<1x32xf32> to vector<8x32xf32>
    %206 = arith.addf %204, %205 : vector<8x32xf32>
    %cst_69 = arith.constant dense<0.000000e+00> : vector<8xf32>
    %207 = vector.multi_reduction <add>, %206, %cst_69 [1] : vector<8x32xf32> to vector<8xf32>
    %208 = vector.shape_cast %207 : vector<8xf32> to vector<8x1xf32>
    %cst_70 = arith.constant 3.200000e+01 : f32
    %209 = vector.broadcast %cst_70 : f32 to vector<8x1xf32>
    %210 = arith.divf %208, %209 : vector<8x1xf32>
    %211 = vector.broadcast %210 : vector<8x1xf32> to vector<8x32xf32>
    %212 = arith.subf %206, %211 : vector<8x32xf32>
    %213 = arith.mulf %212, %212 : vector<8x32xf32>
    %cst_71 = arith.constant dense<0.000000e+00> : vector<8xf32>
    %214 = vector.multi_reduction <add>, %213, %cst_71 [1] : vector<8x32xf32> to vector<8xf32>
    %215 = vector.shape_cast %214 : vector<8xf32> to vector<8x1xf32>
    %cst_72 = arith.constant 3.200000e+01 : f32
    %216 = vector.broadcast %cst_72 : f32 to vector<8x1xf32>
    %217 = arith.divf %215, %216 : vector<8x1xf32>
    %218 = vector.broadcast %210 : vector<8x1xf32> to vector<8x32xf32>
    %219 = arith.subf %206, %218 : vector<8x32xf32>
    %cst_73 = arith.constant 9.99999997E-7 : f32
    %220 = vector.broadcast %cst_73 : f32 to vector<8x1xf32>
    %221 = arith.addf %217, %220 : vector<8x1xf32>
    %222 = math.rsqrt %221 : vector<8x1xf32>
    %223 = vector.broadcast %222 : vector<8x1xf32> to vector<8x32xf32>
    %224 = arith.mulf %219, %223 : vector<8x32xf32>
    %225 = vector.broadcast %155 : vector<1x32xf32> to vector<8x32xf32>
    %226 = arith.mulf %224, %225 : vector<8x32xf32>
    %227 = vector.broadcast %156 : vector<1x32xf32> to vector<8x32xf32>
    %228 = arith.addf %226, %227 : vector<8x32xf32>
    %c1_74 = arith.constant 1 : index
    %c0_75 = arith.constant 0 : index
    %c0_76 = arith.constant 0 : index
    %229 = vector.load %arg6[%c1_74, %c0_75, %c0_76] : memref<2x32x64xf32, #tpu.memory_space<vmem>>, vector<1x32x64xf32>
    %230 = vector.shape_cast %229 : vector<1x32x64xf32> to vector<32x64xf32>
    %cst_77 = arith.constant dense<0.000000e+00> : vector<8x64xf32>
    %231 = tpu.matmul %228, %230, %cst_77 {dimension_numbers = #tpu.dot_dimension_numbers<[1], [0], [0], [1], [0, 0, 1, 1], [], []>} : vector<8x32xf32>, vector<32x64xf32>, vector<8x64xf32> -> vector<8x64xf32>
    %c1_78 = arith.constant 1 : index
    %c0_79 = arith.constant 0 : index
    %c0_80 = arith.constant 0 : index
    %232 = vector.load %arg7[%c1_78, %c0_79, %c0_80] : memref<2x1x64xf32, #tpu.memory_space<vmem>>, vector<1x1x64xf32>
    %233 = vector.shape_cast %232 : vector<1x1x64xf32> to vector<1x64xf32>
    %234 = vector.broadcast %233 : vector<1x64xf32> to vector<8x64xf32>
    %235 = arith.addf %231, %234 : vector<8x64xf32>
    %cst_81 = arith.constant 0.000000e+00 : f32
    %236 = vector.broadcast %cst_81 : f32 to vector<8x64xf32>
    %237 = arith.maximumf %235, %236 : vector<8x64xf32>
    %c1_82 = arith.constant 1 : index
    %c0_83 = arith.constant 0 : index
    %c0_84 = arith.constant 0 : index
    %238 = vector.load %arg8[%c1_82, %c0_83, %c0_84] : memref<2x64x32xf32, #tpu.memory_space<vmem>>, vector<1x64x32xf32>
    %239 = vector.shape_cast %238 : vector<1x64x32xf32> to vector<64x32xf32>
    %cst_85 = arith.constant dense<0.000000e+00> : vector<8x32xf32>
    %240 = tpu.matmul %237, %239, %cst_85 {dimension_numbers = #tpu.dot_dimension_numbers<[1], [0], [0], [1], [0, 0, 1, 1], [], []>} : vector<8x64xf32>, vector<64x32xf32>, vector<8x32xf32> -> vector<8x32xf32>
    %241 = vector.broadcast %157 : vector<1x32xf32> to vector<8x32xf32>
    %242 = arith.addf %240, %241 : vector<8x32xf32>
    %cst_86 = arith.constant 0.000000e+00 : f32
    %243 = vector.broadcast %cst_86 : f32 to vector<8x32xf32>
    %244 = arith.maximumf %242, %243 : vector<8x32xf32>
    %245 = arith.addf %228, %244 : vector<8x32xf32>
    %cst_87 = arith.constant dense<0.000000e+00> : vector<8xf32>
    %246 = vector.multi_reduction <add>, %245, %cst_87 [1] : vector<8x32xf32> to vector<8xf32>
    %247 = vector.shape_cast %246 : vector<8xf32> to vector<8x1xf32>
    %cst_88 = arith.constant 3.200000e+01 : f32
    %248 = vector.broadcast %cst_88 : f32 to vector<8x1xf32>
    %249 = arith.divf %247, %248 : vector<8x1xf32>
    %250 = vector.broadcast %249 : vector<8x1xf32> to vector<8x32xf32>
    %251 = arith.subf %245, %250 : vector<8x32xf32>
    %252 = arith.mulf %251, %251 : vector<8x32xf32>
    %cst_89 = arith.constant dense<0.000000e+00> : vector<8xf32>
    %253 = vector.multi_reduction <add>, %252, %cst_89 [1] : vector<8x32xf32> to vector<8xf32>
    %254 = vector.shape_cast %253 : vector<8xf32> to vector<8x1xf32>
    %cst_90 = arith.constant 3.200000e+01 : f32
    %255 = vector.broadcast %cst_90 : f32 to vector<8x1xf32>
    %256 = arith.divf %254, %255 : vector<8x1xf32>
    %257 = vector.broadcast %249 : vector<8x1xf32> to vector<8x32xf32>
    %258 = arith.subf %245, %257 : vector<8x32xf32>
    %cst_91 = arith.constant 9.99999997E-7 : f32
    %259 = vector.broadcast %cst_91 : f32 to vector<8x1xf32>
    %260 = arith.addf %256, %259 : vector<8x1xf32>
    %261 = math.rsqrt %260 : vector<8x1xf32>
    %262 = vector.broadcast %261 : vector<8x1xf32> to vector<8x32xf32>
    %263 = arith.mulf %258, %262 : vector<8x32xf32>
    %264 = vector.broadcast %158 : vector<1x32xf32> to vector<8x32xf32>
    %265 = arith.mulf %263, %264 : vector<8x32xf32>
    %266 = vector.broadcast %159 : vector<1x32xf32> to vector<8x32xf32>
    %267 = arith.addf %265, %266 : vector<8x32xf32>
    %268 = vector.shape_cast %267 : vector<8x32xf32> to vector<1x8x32xf32>
    %269 = vector.extract_strided_slice %268 {offsets = [0, 0, 0], sizes = [1, 1, 32], strides = [1, 1, 1]} : vector<1x8x32xf32> to vector<1x1x32xf32>
    %270 = vector.shape_cast %269 : vector<1x1x32xf32> to vector<1x32xf32>
    %c0_92 = arith.constant 0 : index
    %c0_93 = arith.constant 0 : index
    %c0_94 = arith.constant 0 : index
    %271 = vector.load %arg9[%c0_92, %c0_93, %c0_94] : memref<8x32x64xf32, #tpu.memory_space<vmem>>, vector<1x32x64xf32>
    %272 = vector.shape_cast %271 : vector<1x32x64xf32> to vector<32x64xf32>
    %cst_95 = arith.constant dense<0.000000e+00> : vector<1x64xf32>
    %273 = tpu.matmul %270, %272, %cst_95 {dimension_numbers = #tpu.dot_dimension_numbers<[1], [0], [0], [1], [0, 0, 1, 1], [], []>} : vector<1x32xf32>, vector<32x64xf32>, vector<1x64xf32> -> vector<1x64xf32>
    %274 = vector.extract_strided_slice %268 {offsets = [0, 1, 0], sizes = [1, 1, 32], strides = [1, 1, 1]} : vector<1x8x32xf32> to vector<1x1x32xf32>
    %275 = vector.shape_cast %274 : vector<1x1x32xf32> to vector<1x32xf32>
    %c1_96 = arith.constant 1 : index
    %c0_97 = arith.constant 0 : index
    %c0_98 = arith.constant 0 : index
    %276 = vector.load %arg9[%c1_96, %c0_97, %c0_98] : memref<8x32x64xf32, #tpu.memory_space<vmem>>, vector<1x32x64xf32>
    %277 = vector.shape_cast %276 : vector<1x32x64xf32> to vector<32x64xf32>
    %cst_99 = arith.constant dense<0.000000e+00> : vector<1x64xf32>
    %278 = tpu.matmul %275, %277, %cst_99 {dimension_numbers = #tpu.dot_dimension_numbers<[1], [0], [0], [1], [0, 0, 1, 1], [], []>} : vector<1x32xf32>, vector<32x64xf32>, vector<1x64xf32> -> vector<1x64xf32>
    %279 = vector.extract_strided_slice %268 {offsets = [0, 2, 0], sizes = [1, 1, 32], strides = [1, 1, 1]} : vector<1x8x32xf32> to vector<1x1x32xf32>
    %280 = vector.shape_cast %279 : vector<1x1x32xf32> to vector<1x32xf32>
    %c2 = arith.constant 2 : index
    %c0_100 = arith.constant 0 : index
    %c0_101 = arith.constant 0 : index
    %281 = vector.load %arg9[%c2, %c0_100, %c0_101] : memref<8x32x64xf32, #tpu.memory_space<vmem>>, vector<1x32x64xf32>
    %282 = vector.shape_cast %281 : vector<1x32x64xf32> to vector<32x64xf32>
    %cst_102 = arith.constant dense<0.000000e+00> : vector<1x64xf32>
    %283 = tpu.matmul %280, %282, %cst_102 {dimension_numbers = #tpu.dot_dimension_numbers<[1], [0], [0], [1], [0, 0, 1, 1], [], []>} : vector<1x32xf32>, vector<32x64xf32>, vector<1x64xf32> -> vector<1x64xf32>
    %284 = vector.extract_strided_slice %268 {offsets = [0, 3, 0], sizes = [1, 1, 32], strides = [1, 1, 1]} : vector<1x8x32xf32> to vector<1x1x32xf32>
    %285 = vector.shape_cast %284 : vector<1x1x32xf32> to vector<1x32xf32>
    %c3 = arith.constant 3 : index
    %c0_103 = arith.constant 0 : index
    %c0_104 = arith.constant 0 : index
    %286 = vector.load %arg9[%c3, %c0_103, %c0_104] : memref<8x32x64xf32, #tpu.memory_space<vmem>>, vector<1x32x64xf32>
    %287 = vector.shape_cast %286 : vector<1x32x64xf32> to vector<32x64xf32>
    %cst_105 = arith.constant dense<0.000000e+00> : vector<1x64xf32>
    %288 = tpu.matmul %285, %287, %cst_105 {dimension_numbers = #tpu.dot_dimension_numbers<[1], [0], [0], [1], [0, 0, 1, 1], [], []>} : vector<1x32xf32>, vector<32x64xf32>, vector<1x64xf32> -> vector<1x64xf32>
    %289 = vector.extract_strided_slice %268 {offsets = [0, 4, 0], sizes = [1, 1, 32], strides = [1, 1, 1]} : vector<1x8x32xf32> to vector<1x1x32xf32>
    %290 = vector.shape_cast %289 : vector<1x1x32xf32> to vector<1x32xf32>
    %c4 = arith.constant 4 : index
    %c0_106 = arith.constant 0 : index
    %c0_107 = arith.constant 0 : index
    %291 = vector.load %arg9[%c4, %c0_106, %c0_107] : memref<8x32x64xf32, #tpu.memory_space<vmem>>, vector<1x32x64xf32>
    %292 = vector.shape_cast %291 : vector<1x32x64xf32> to vector<32x64xf32>
    %cst_108 = arith.constant dense<0.000000e+00> : vector<1x64xf32>
    %293 = tpu.matmul %290, %292, %cst_108 {dimension_numbers = #tpu.dot_dimension_numbers<[1], [0], [0], [1], [0, 0, 1, 1], [], []>} : vector<1x32xf32>, vector<32x64xf32>, vector<1x64xf32> -> vector<1x64xf32>
    %294 = vector.extract_strided_slice %268 {offsets = [0, 5, 0], sizes = [1, 1, 32], strides = [1, 1, 1]} : vector<1x8x32xf32> to vector<1x1x32xf32>
    %295 = vector.shape_cast %294 : vector<1x1x32xf32> to vector<1x32xf32>
    %c5 = arith.constant 5 : index
    %c0_109 = arith.constant 0 : index
    %c0_110 = arith.constant 0 : index
    %296 = vector.load %arg9[%c5, %c0_109, %c0_110] : memref<8x32x64xf32, #tpu.memory_space<vmem>>, vector<1x32x64xf32>
    %297 = vector.shape_cast %296 : vector<1x32x64xf32> to vector<32x64xf32>
    %cst_111 = arith.constant dense<0.000000e+00> : vector<1x64xf32>
    %298 = tpu.matmul %295, %297, %cst_111 {dimension_numbers = #tpu.dot_dimension_numbers<[1], [0], [0], [1], [0, 0, 1, 1], [], []>} : vector<1x32xf32>, vector<32x64xf32>, vector<1x64xf32> -> vector<1x64xf32>
    %299 = vector.extract_strided_slice %268 {offsets = [0, 6, 0], sizes = [1, 1, 32], strides = [1, 1, 1]} : vector<1x8x32xf32> to vector<1x1x32xf32>
    %300 = vector.shape_cast %299 : vector<1x1x32xf32> to vector<1x32xf32>
    %c6 = arith.constant 6 : index
    %c0_112 = arith.constant 0 : index
    %c0_113 = arith.constant 0 : index
    %301 = vector.load %arg9[%c6, %c0_112, %c0_113] : memref<8x32x64xf32, #tpu.memory_space<vmem>>, vector<1x32x64xf32>
    %302 = vector.shape_cast %301 : vector<1x32x64xf32> to vector<32x64xf32>
    %cst_114 = arith.constant dense<0.000000e+00> : vector<1x64xf32>
    %303 = tpu.matmul %300, %302, %cst_114 {dimension_numbers = #tpu.dot_dimension_numbers<[1], [0], [0], [1], [0, 0, 1, 1], [], []>} : vector<1x32xf32>, vector<32x64xf32>, vector<1x64xf32> -> vector<1x64xf32>
    %304 = vector.extract_strided_slice %268 {offsets = [0, 7, 0], sizes = [1, 1, 32], strides = [1, 1, 1]} : vector<1x8x32xf32> to vector<1x1x32xf32>
    %305 = vector.shape_cast %304 : vector<1x1x32xf32> to vector<1x32xf32>
    %c7 = arith.constant 7 : index
    %c0_115 = arith.constant 0 : index
    %c0_116 = arith.constant 0 : index
    %306 = vector.load %arg9[%c7, %c0_115, %c0_116] : memref<8x32x64xf32, #tpu.memory_space<vmem>>, vector<1x32x64xf32>
    %307 = vector.shape_cast %306 : vector<1x32x64xf32> to vector<32x64xf32>
    %cst_117 = arith.constant dense<0.000000e+00> : vector<1x64xf32>
    %308 = tpu.matmul %305, %307, %cst_117 {dimension_numbers = #tpu.dot_dimension_numbers<[1], [0], [0], [1], [0, 0, 1, 1], [], []>} : vector<1x32xf32>, vector<32x64xf32>, vector<1x64xf32> -> vector<1x64xf32>
    %309 = arith.addf %273, %278 : vector<1x64xf32>
    %310 = arith.addf %283, %288 : vector<1x64xf32>
    %311 = arith.addf %293, %298 : vector<1x64xf32>
    %312 = arith.addf %303, %308 : vector<1x64xf32>
    %313 = arith.addf %309, %310 : vector<1x64xf32>
    %314 = arith.addf %311, %312 : vector<1x64xf32>
    %315 = arith.addf %313, %314 : vector<1x64xf32>
    %c0_118 = arith.constant 0 : index
    %c0_119 = arith.constant 0 : index
    %316 = vector.load %arg10[%c0_118, %c0_119] : memref<1x64xf32, #tpu.memory_space<vmem>>, vector<1x64xf32>
    %317 = arith.addf %315, %316 : vector<1x64xf32>
    %cst_120 = arith.constant 0.000000e+00 : f32
    %318 = vector.broadcast %cst_120 : f32 to vector<1x64xf32>
    %319 = arith.maximumf %317, %318 : vector<1x64xf32>
    %c0_121 = arith.constant 0 : index
    %c0_122 = arith.constant 0 : index
    %320 = vector.load %arg11[%c0_121, %c0_122] : memref<64x16xf32, #tpu.memory_space<vmem>>, vector<64x16xf32>
    %cst_123 = arith.constant dense<0.000000e+00> : vector<1x16xf32>
    %321 = tpu.matmul %319, %320, %cst_123 {dimension_numbers = #tpu.dot_dimension_numbers<[1], [0], [0], [1], [0, 0, 1, 1], [], []>} : vector<1x64xf32>, vector<64x16xf32>, vector<1x16xf32> -> vector<1x16xf32>
    %c0_124 = arith.constant 0 : index
    %c0_125 = arith.constant 0 : index
    %322 = vector.load %arg12[%c0_124, %c0_125] : memref<1x16xf32, #tpu.memory_space<vmem>>, vector<1x16xf32>
    %323 = arith.addf %321, %322 : vector<1x16xf32>
    %324 = vector.shape_cast %323 : vector<1x16xf32> to vector<1x1x16xf32>
    %c0_126 = arith.constant 0 : index
    %c0_127 = arith.constant 0 : index
    %c0_128 = arith.constant 0 : index
    %325 = vector.load %arg13[%c0_126, %c0_127, %c0_128] : memref<1x1x16xf32, #tpu.memory_space<vmem>>, vector<1x1x16xf32>
    tpu.vector_store %arg13[%c0_126, %c0_127, %c0_128], %324 {strides = array<i32>} : memref<1x1x16xf32, #tpu.memory_space<vmem>>, vector<1x1x16xf32>,
    return
  }
  func.func @transform_0(%arg0: i32) -> (i32, i32, i32) {
    %c0_i32 = arith.constant 0 : i32
    %c0_i32_0 = arith.constant 0 : i32
    %c0_i32_1 = arith.constant 0 : i32
    return %arg0, %c0_i32, %c0_i32_0 : i32, i32, i32
  }
  func.func @transform_1(%arg0: i32) -> (i32, i32) {
    %c0_i32 = arith.constant 0 : i32
    %c0_i32_0 = arith.constant 0 : i32
    %c0_i32_1 = arith.constant 0 : i32
    return %c0_i32, %c0_i32_0 : i32, i32
  }
  func.func @transform_2(%arg0: i32) -> (i32, i32, i32) {
    %c0_i32 = arith.constant 0 : i32
    %c0_i32_0 = arith.constant 0 : i32
    %c0_i32_1 = arith.constant 0 : i32
    %c0_i32_2 = arith.constant 0 : i32
    return %c0_i32, %c0_i32_0, %c0_i32_1 : i32, i32, i32
  }
  func.func @transform_3(%arg0: i32) -> (i32, i32, i32) {
    %c0_i32 = arith.constant 0 : i32
    %c0_i32_0 = arith.constant 0 : i32
    %c0_i32_1 = arith.constant 0 : i32
    %c0_i32_2 = arith.constant 0 : i32
    return %c0_i32, %c0_i32_0, %c0_i32_1 : i32, i32, i32
  }
  func.func @transform_4(%arg0: i32) -> (i32, i32, i32) {
    %c0_i32 = arith.constant 0 : i32
    %c0_i32_0 = arith.constant 0 : i32
    %c0_i32_1 = arith.constant 0 : i32
    %c0_i32_2 = arith.constant 0 : i32
    return %c0_i32, %c0_i32_0, %c0_i32_1 : i32, i32, i32
  }
  func.func @transform_5(%arg0: i32) -> (i32, i32, i32) {
    %c0_i32 = arith.constant 0 : i32
    %c0_i32_0 = arith.constant 0 : i32
    %c0_i32_1 = arith.constant 0 : i32
    %c0_i32_2 = arith.constant 0 : i32
    return %c0_i32, %c0_i32_0, %c0_i32_1 : i32, i32, i32
  }
  func.func @transform_6(%arg0: i32) -> (i32, i32, i32) {
    %c0_i32 = arith.constant 0 : i32
    %c0_i32_0 = arith.constant 0 : i32
    %c0_i32_1 = arith.constant 0 : i32
    %c0_i32_2 = arith.constant 0 : i32
    return %c0_i32, %c0_i32_0, %c0_i32_1 : i32, i32, i32
  }
  func.func @transform_7(%arg0: i32) -> (i32, i32, i32) {
    %c0_i32 = arith.constant 0 : i32
    %c0_i32_0 = arith.constant 0 : i32
    %c0_i32_1 = arith.constant 0 : i32
    %c0_i32_2 = arith.constant 0 : i32
    return %c0_i32, %c0_i32_0, %c0_i32_1 : i32, i32, i32
  }
  func.func @transform_8(%arg0: i32) -> (i32, i32, i32) {
    %c0_i32 = arith.constant 0 : i32
    %c0_i32_0 = arith.constant 0 : i32
    %c0_i32_1 = arith.constant 0 : i32
    %c0_i32_2 = arith.constant 0 : i32
    return %c0_i32, %c0_i32_0, %c0_i32_1 : i32, i32, i32
  }
  func.func @transform_9(%arg0: i32) -> (i32, i32) {
    %c0_i32 = arith.constant 0 : i32
    %c0_i32_0 = arith.constant 0 : i32
    %c0_i32_1 = arith.constant 0 : i32
    return %c0_i32, %c0_i32_0 : i32, i32
  }
  func.func @transform_10(%arg0: i32) -> (i32, i32) {
    %c0_i32 = arith.constant 0 : i32
    %c0_i32_0 = arith.constant 0 : i32
    %c0_i32_1 = arith.constant 0 : i32
    return %c0_i32, %c0_i32_0 : i32, i32
  }
  func.func @transform_11(%arg0: i32) -> (i32, i32) {
    %c0_i32 = arith.constant 0 : i32
    %c0_i32_0 = arith.constant 0 : i32
    %c0_i32_1 = arith.constant 0 : i32
    return %c0_i32, %c0_i32_0 : i32, i32
  }
  func.func @transform_12(%arg0: i32) -> (i32, i32, i32) {
    %c0_i32 = arith.constant 0 : i32
    %c0_i32_0 = arith.constant 0 : i32
    %c0_i32_1 = arith.constant 0 : i32
    return %arg0, %c0_i32, %c0_i32_0 : i32, i32, i32
  }
}

</mosaic_0001>

<bundles_post_ra>
// kernel: tpu_custom_call.1
= control target key start
LH: loop header
LB: loop body
LE: loop exit
PB: predicated region body
PF: predicated region fallthrough
CT: control target
= control target key end

     0   :  { %s4687_s0 = inlined_call_operand.hbm [shape: f32[2,8,32], index: 0, kind: input, shape index: {}]   ;;  %s4688_s1 = inlined_call_operand.hbm [shape: f32[4,8], index: 1, kind: input, shape index: {}]   ;;  %s4689_s2 = inlined_call_operand.vmem [shape: f32[2,32,96], index: 2, kind: input, shape index: {}]   ;;  %s4690_s3 = inlined_call_operand.hbm [shape: f32[2,32,32], index: 3, kind: input, shape index: {}]   ;;  %s4691_s4 = inlined_call_operand.vmem [shape: f32[2,6,32], index: 4, kind: input, shape index: {}]   ;;  %s4692_s5 = inlined_call_operand.hbm [shape: f32[2,32,64], index: 5, kind: input, shape index: {}]   ;;  %s4693_s6 = inlined_call_operand.hbm [shape: f32[2,1,64], index: 6, kind: input, shape index: {}]   ;;  %s4694_s7 = inlined_call_operand.vmem [shape: f32[2,64,32], index: 7, kind: input, shape index: {}]   ;;  %s4695_s8 = inlined_call_operand.vmem [shape: f32[8,32,64], index: 8, kind: input, shape index: {}]   ;;  %s4696_s9 = inlined_call_operand.vmem [shape: f32[1,64], index: 9, kind: input, shape index: {}]   ;;  %s4697_s10 = inlined_call_operand.vmem [shape: f32[64,16], index: 10, kind: input, shape index: {}]   ;;  %s4698_s11 = inlined_call_operand.vmem [shape: f32[1,16], index: 11, kind: input, shape index: {}]   ;;  %s4699_s12 = inlined_call_operand.hbm [shape: f32[2,1,16], index: 12, kind: output, shape index: {}]  }
   0x1   :  { %4706 = sst [smem:[#allocation16_spill]] %s4688_s1 }
   0x2   :  { %4707 = sst [smem:[#allocation17_spill]] %s4690_s3 }
   0x3   :  { %4708 = sst [smem:[#allocation18_spill]] %s4692_s5 }
   0x4   :  { %4709 = sst [smem:[#allocation19_spill]] %s4698_s11 }
   0x5   :  { %4710 = sst [smem:[#allocation20_spill]] %s4699_s12 }
   0x6   :  { %17 = vsyncpa [#allocation3], 0 }
   0x7   :  { %19 = vsyncpa [#allocation3 + $0x1], 0 }
   0x8   :  { %20 = vsyncpa [#allocation6], 0 }
   0x9   :  { %21 = vsyncpa [#allocation9], 0 }
   0xa   :  { %22 = vsyncpa [#allocation4], 0 }
   0xb   :  { %24 = vsyncpa [#allocation4 + $0x1], 0  ;;  %s3940_s21 = smov 0   ;;  %s3942_s22 = smov 0  }
   0xc   :  { %s3944_s23 = smov 0   ;;  %s3946_s24 = smov 0  }
   0xd LB: > { %s3849_s25 = smov [#allocation5]   ;;  %s3961_s27 = sadd.s32 4294967295, %s3847_s24   ;;  %s3847_s24 = sphi %s3946_s24, %s4738_s24   ;;  %s3843_s23 = sphi %s3944_s23, %s4737_s23   ;;  %s3839_s22 = sphi %s3942_s22, %s4736_s22   ;;  %s3835_s21 = sphi %s3940_s21, %s4735_s21  }
   0xe   : > { %s331_s26 = sshll.u32 %s3849_s25, 4  ;;  %p2913_p0 = scmp.ge.s32.totalorder %s3847_s24, 1  ;;  %s332_s26 = int_to_ptr.vmem [resolvable:$true] %s331_s26 }
   0xf   : > { %p4700_p1 = scmp.eq.s32.totalorder %s3961_s27, 0  ;;  %p318_p2 = scmp.lt.s32.totalorder %s3847_s24, 3 }
  0x10   : > { %s3850_s29 = smov [#allocation8]   ;;  %s3851_s14 = smov [#allocation7]  }
  0x11   : > { %p3966_p3 = pnand %p2913_p0, %p318_p2  ;;  %s360_s30 = sshll.u32 %s3850_s29, 4  ;;  %s3979_s30 = int_to_ptr.vmem [resolvable:$true] %s360_s30 }
  0x12   : > { %s344_s15 = sshll.u32 %s3851_s14, 4  ;;  %s4713_s1 = sld [smem:[#allocation16_spill]]  ;;  %s3981_s15 = int_to_ptr.vmem [resolvable:$true] %s344_s15 }
  0x13   : > { %s4711_s28 = scalar_select %p3966_p3, 1, 0 }
  0x14   : > { %p3514_p5 = pneg %p3966_p3 }
  0x16   : > { %p3975_p6 = pnand %p3514_p5, %p4700_p1 }
  0x18   : > { %s3631_s18 = scalar_lea.hbm %s4713_s1, 64  ;;  %p3991_p8 = pneg %p3975_p6 }
  0x19   : > { %p3632_p7 = scmp.ne.s32.totalorder %s4713_s1, %s3631_s18  ;;  %p3638_p11 = scmp.lt.u32.totalorder %s3631_s18, %s4713_s1 }
  0x1b   : > { %p3634_p9 = pnand %p3991_p8, %p3632_p7 }
  0x1d   : > { %p3635_p10 = pneg %p3634_p9 }
  0x1f   : > { %p3640_p12 = pnand %p3638_p11, %p3635_p10 }
  0x21   : > { %3643 = shalt.err (!%p3640_p12)
}
  0x22   : > { %s3644_s16 = scalar_lea.vmem %s332_s26, 64  ;;  %p3652_p5 = scmp.lt.s32.totalorder %s332_s26, %s332_s26 }
  0x23   : > { %p3645_p13 = scmp.ne.s32.totalorder %s332_s26, %s3644_s16  ;;  %p3653_p4 = scmp.lt.s32.totalorder %s3644_s16, %s3644_s16 }
  0x25   : > { %p3647_p0 = pnand %p3645_p13, %p3991_p8  ;;  %p3654_p1 = por %p3653_p4, %p3652_p5 }
  0x27   : > { %p3648_p2 = pneg %p3647_p0 }
  0x29   : > { %p3655_p3 = pnand %p3654_p1, %p3648_p2 }
  0x2b   : > { %3658 = shalt.err (!%p3655_p3)
}
  0x2c   : > { %3517 = dma.hbm_to_vmem [thread:$0]  (!%p3975_p6), %s4713_s1, 64, %s332_s26, [#allocation6]  }
  0x2d   : > { %s4715_s5 = sld [smem:[#allocation18_spill]] }
  0x33   : > { %s3659_s29 = scalar_lea.hbm %s4715_s5, 1024 }
  0x34   : > { %p3660_p7 = scmp.ne.s32.totalorder %s4715_s5, %s3659_s29  ;;  %p3666_p1 = scmp.lt.u32.totalorder %s3659_s29, %s4715_s5 }
  0x36   : > { %p3662_p9 = pnand %p3660_p7, %p3991_p8 }
  0x38   : > { %p3663_p4 = pneg %p3662_p9 }
  0x3a   : > { %p3668_p3 = pnand %p3666_p1, %p3663_p4 }
  0x3c   : > { %3671 = shalt.err (!%p3668_p3)
}
  0x3d   : > { %s3672_s26 = scalar_lea.vmem %s3979_s30, 1024  ;;  %p3680_p13 = scmp.lt.s32.totalorder %s3979_s30, %s3979_s30 }
  0x3e   : > { %p3673_p10 = scmp.ne.s32.totalorder %s3979_s30, %s3672_s26  ;;  %p3681_p0 = scmp.lt.s32.totalorder %s3672_s26, %s3672_s26 }
  0x40   : > { %p3675_p11 = pnand %p3673_p10, %p3991_p8  ;;  %p3682_p2 = por %p3681_p0, %p3680_p13 }
  0x42   : > { %p3676_p12 = pneg %p3675_p11 }
  0x44   : > { %p3683_p5 = pnand %p3682_p2, %p3676_p12 }
  0x46   : > { %3686 = shalt.err (!%p3683_p5)
}
  0x47   : > { %s3852_s12 = smov 128   ;;  %s3853_s11 = smov 8  }
  0x48   : > { %3523 = dma.hbm_to_vmem [thread:$0]  (!%p3975_p6), %s4715_s5, 1024, %s3979_s30, [#allocation9], %s3852_s12, %s3852_s12, %s3853_s11  }
  0x49   : > { %s4716_s3 = sld [smem:[#allocation17_spill]] }
  0x4f   : > { %s3687_s29 = scalar_lea.hbm %s4716_s3, 1024 }
  0x50   : > { %p3688_p7 = scmp.ne.s32.totalorder %s4716_s3, %s3687_s29  ;;  %p3694_p1 = scmp.lt.u32.totalorder %s3687_s29, %s4716_s3 }
  0x52   : > { %p3690_p9 = pnand %p3688_p7, %p3991_p8 }
  0x54   : > { %p3691_p4 = pneg %p3690_p9 }
  0x56   : > { %p3696_p3 = pnand %p3694_p1, %p3691_p4 }
  0x58   : > { %3699 = shalt.err (!%p3696_p3)
}
  0x59   : > { %s3700_s30 = scalar_lea.vmem %s3981_s15, 1024  ;;  %p3708_p13 = scmp.lt.s32.totalorder %s3981_s15, %s3981_s15 }
  0x5a   : > { %p3701_p10 = scmp.ne.s32.totalorder %s3981_s15, %s3700_s30  ;;  %p3709_p0 = scmp.lt.s32.totalorder %s3700_s30, %s3700_s30 }
  0x5c   : > { %p3703_p11 = pnand %p3701_p10, %p3991_p8  ;;  %p3710_p2 = por %p3709_p0, %p3708_p13 }
  0x5e   : > { %p3704_p12 = pneg %p3703_p11 }
  0x60   : > { %p3711_p5 = pnand %p3710_p2, %p3704_p12 }
  0x62   : > { %3714 = shalt.err (!%p3711_p5)
}
  0x63   : > { %3520 = dma.hbm_to_vmem [thread:$0]  (!%p3975_p6), %s4716_s3, 1024, %s3981_s15, [#allocation6], %s3852_s12, %s3852_s12, %s3853_s11  }
  0x64   : > { %s3854_s19 = smov [#allocation10]   ;;  %s3715_s14 = scalar_lea.hbm %s4693_s6, 32 }
  0x65   : > { %s373_s18 = sshll.u32 %s3854_s19, 4  ;;  %p3716_p7 = scmp.ne.s32.totalorder %s4693_s6, %s3715_s14  ;;  %s374_s18 = int_to_ptr.vmem [resolvable:$true] %s373_s18 }
  0x66   : > { %p3722_p1 = scmp.lt.u32.totalorder %s3715_s14, %s4693_s6 }
  0x67   : > { %p3718_p9 = pnand %p3716_p7, %p3991_p8 }
  0x69   : > { %p3719_p4 = pneg %p3718_p9 }
  0x6b   : > { %p3724_p3 = pnand %p3722_p1, %p3719_p4 }
  0x6d   : > { %3727 = shalt.err (!%p3724_p3)
}
  0x6e   : > { %s3728_s15 = scalar_lea.vmem %s374_s18, 32  ;;  %p3736_p13 = scmp.lt.s32.totalorder %s374_s18, %s374_s18 }
  0x6f   : > { %p3729_p10 = scmp.ne.s32.totalorder %s374_s18, %s3728_s15  ;;  %p3737_p0 = scmp.lt.s32.totalorder %s3728_s15, %s3728_s15 }
  0x71   : > { %p3731_p11 = pnand %p3729_p10, %p3991_p8  ;;  %p3738_p2 = por %p3737_p0, %p3736_p13 }
  0x73   : > { %p3732_p12 = pneg %p3731_p11 }
  0x75   : > { %p3739_p5 = pnand %p3738_p2, %p3732_p12 }
  0x77   : > { %3742 = shalt.err (!%p3739_p5)
}
  0x78   : > { %s3855_s12 = smov 16   ;;  %s3856_s5 = smov 1  }
  0x79   : > { %3526 = dma.hbm_to_vmem [thread:$0]  (!%p3975_p6), %s4693_s6, 32, %s374_s18, [#allocation9], %s3855_s12, %s3855_s12, %s3856_s5  }
  0x7a   : > { %s2912_s1 = sadd.s32 4294967294, %s3847_s24   ;;  %s4073_s17 = sadd.s32 1, %s3847_s24  }
  0x7b   : > { %s34_s19 = ssub.s32 %s3847_s24, %s4073_s17  ;;  %s37_s20 = sadd.s32 1, %s3843_s23 }
  0x7c   : > { %p35_p8 = scmp.eq.s32.totalorder %s34_s19, 0  ;;  %p44_p7 = scmp.ne.s32.totalorder %s3843_s23, %s3839_s22 }
  0x7d   : > { %p45_p9 = scmp.eq.s32.totalorder %s3847_s24, 0  ;;  %p50_p4 = scmp.ne.s32.totalorder %s3839_s22, %s3835_s21 }
  0x7e   : > { %s4084_s29 = scalar_select %p35_p8, %s3843_s23, %s37_s20  }
  0x7f   : > { %p4086_p1 = por %p45_p9, %p44_p7  ;;  %p4718_p3 = scmp.eq.s32.totalorder %s3961_s27, 0 }
  0x80   : > { %p305_p10 = scmp.eq.s32.totalorder %s3961_s27, 1  ;;  %p311_p11 = scmp.eq.s32.totalorder %s2912_s1, 1 }
  0x81   : > { %p4092_p6 = por %p4718_p3, %p50_p4  ;;  %p3539_p12 = scmp.lt.s32.totalorder %s3847_s24, 2 }
  0x82   : > { %s402_s14 = sand.u32 1, %s3843_s23   ;;  %p4099_p13 = por %p305_p10, %p44_p7 }
  0x83   : > { %p4103_p0 = por %p311_p11, %p50_p4  ;;  %s2919_s30 = sshll.u32 %s402_s14, 3 }
  0x84   : > { %s4720_s16 = scalar_select %p4099_p13, 1, 0 }
  0x85   : > { %s4721_s26 = scalar_select %p4103_p0, 1, 0 }
  0x86   : > { %s2920_s15 = sshll.u32 %s3847_s24, 7  ;;  %s406_s11 = scalar_lea.vmem [#allocation2], %s2919_s30 }
  0x87   : > { %s4111_s25 = scalar_lea.hbm %s4687_s0, %s2920_s15  ;;  %s413_s1 = sshll.u32 %s406_s11, 4  ;;  %s4113_s1 = int_to_ptr.vmem [resolvable:$true] %s413_s1 }
  0x88   : > { %p4117_p2 = pnand %p3539_p12, %p4086_p1  ;;  %s403_s20 = scalar_lea.sflag [#allocation3], %s402_s14 }
  0x89   : > { %s3743_s3 = scalar_lea.hbm %s4111_s25, 128  ;;  %s3748_s12 = scalar_lea.hbm %s4687_s0, 256 }
  0x8a   : > { %p3744_p5 = scmp.ne.s32.totalorder %s4111_s25, %s3743_s3  ;;  %p3745_p8 = pneg %p4117_p2 }
  0x8b   : > { %p3749_p4 = scmp.lt.u32.totalorder %s4111_s25, %s4687_s0  ;;  %p3750_p1 = scmp.lt.u32.totalorder %s3748_s12, %s3743_s3 }
  0x8c   : > { %p3746_p7 = pnand %p3745_p8, %p3744_p5  ;;  %p3752_p10 = scmp.lt.u32.totalorder %s3743_s3, %s4111_s25 }
  0x8d   : > { %p3751_p3 = por %p3750_p1, %p3749_p4 }
  0x8e   : > { %p3747_p9 = pneg %p3746_p7 }
  0x8f   : > { %p3753_p11 = por %p3752_p10, %p3751_p3 }
  0x91   : > { %p3754_p12 = pnand %p3753_p11, %p3747_p9 }
  0x93   : > { %3757 = shalt.err (!%p3754_p12)
}
  0x94   : > { %s3758_s14 = scalar_lea.vmem %s4113_s1, 128  ;;  %s3857_s11 = smov [#allocation2]  }
  0x95   : > { %p3759_p5 = scmp.ne.s32.totalorder %s4113_s1, %s3758_s14  ;;  %s3763_s30 = sshll.u32 %s3857_s11, 4  ;;  %s3764_s30 = int_to_ptr.vmem [resolvable:$false] %s3763_s30 }
  0x96   : > { %s3765_s15 = scalar_lea.vmem %s3764_s30, 256  ;;  %p3766_p13 = scmp.lt.s32.totalorder %s4113_s1, %s3764_s30 }
  0x97   : > { %p3761_p7 = pnand %p3759_p5, %p3745_p8  ;;  %p3767_p4 = scmp.lt.s32.totalorder %s3765_s15, %s3758_s14 }
  0x99   : > { %p3762_p0 = pneg %p3761_p7  ;;  %p3768_p1 = por %p3767_p4, %p3766_p13 }
  0x9b   : > { %p3769_p3 = pnand %p3768_p1, %p3762_p0 }
  0x9d   : > { %3772 = shalt.err (!%p3769_p3)
}
  0x9e   : > { %3530 = dma.hbm_to_vmem [thread:$0]  (!%p4117_p2), %s4111_s25, 128, %s4113_s1, %s403_s20  }
  0x9f   : > { %p4723_p9 = scmp.ne.s32.totalorder %s4711_s28, 0 }
  0xa0   : > { %s4149_s3 = sand.u32 (!%p4723_p9), 1, %s3839_s22  }
  0xa1   : > { %422 = sbr.rel (%p4723_p9) target bundleno = 5962 (0x174a), region = 68  ;;  %s2922_s12 = sshll.u32 (!%p4723_p9), %s4149_s3, 3 }
  0xa2   : > { %s425_s13 = scalar_lea.sflag (!%p4723_p9), [#allocation3], %s4149_s3  ;;  %s428_s5 = scalar_lea.vmem (!%p4723_p9), [#allocation2], %s2922_s12 }
  0xa8   : > { %3818 = dma.done.wait (%p4092_p6), %s425_s13, 128  }
  0xa9   : > { %3820 = vsyncadd (%p4092_p6), %s425_s13, 4294967168  ;;  %p4724_p13 = scmp.eq.s32.totalorder %s3961_s27, 0 }
  0xab   : > { %3822 = dma.done.wait (%p4724_p13), [#allocation6], 1088   ;;  %p4725_p0 = pmov %p4724_p13 }
  0xad   : > { %3824 = vsyncadd (%p4725_p0), [#allocation6], 4294966208  ;;  %p4726_p2 = pmov %p4725_p0 }
  0xae   : > { %p4727_p8 = pmov %p4725_p0 }
  0xaf   : > { %3826 = dma.done.wait (%p4726_p2), [#allocation9], 1056  }
  0xb0   : > { %3828 = vsyncadd (%p4727_p8), [#allocation9], 4294966240  ;;  %v485_v0 = vlaneseq  ;;  %vm489_vm1 = vcmask 261120   ;;  %v4173_v4 = vld [vmem:[%s428_s5] sm:$0xff]  ;;  %v4175_v5 = vld [vmem:[#allocation5] sm:$0xf] }
  0xb1   : > { %v3858_v11 = vmov 0   ;;  %v3859_v28 = vmov 683565275   ;;  %v3860_v30 = vmov 2475754826   ;;  %vm3866_vm15 = vmmov 0  }
  0xb2   : > { %v4165_v1 = vand.u32 127, %v485_v0  ;;  %v4167_v2 = vshrl.u32 %v485_v0, 7  ;;  %3601 = vset.pattern.permute.xlu1 %v3858_v11  ;;  %3602 = vset.pattern.permute.xlu0 %v3858_v11  ;;  %v3861_v33 = vmov 2131351028   ;;  %v3862_v36 = vmov 2102212464  }
  0xb3   : > { %v3863_v39 = vmov 920167782   ;;  %v3864_v42 = vmov 1326507024   ;;  %s3868_s30 = smov 96   ;;  %s3869_s15 = smov 80  }
  0xb4   : > { %v4170_v3 = vsub.s32 3, %v4167_v2  ;;  %vm487_vm0 = vcmp.lt.s32.totalorder %v4165_v1, 30  ;;  %v4182_v9 = vsub.s32 2, %v4167_v2  ;;  %s3870_s12 = smov 112   ;;  %s3871_s13 = smov 48  }
  0xb5   : > { %v488_v6 = vsel %vm487_vm0, %v4173_v4, 0.0  ;;  %vm628_vm0 = vcmp.eq.s32.totalorder %v4165_v1, 30  ;;  %s4705_s5 = smov 64   ;;  %s4704_s28 = smov 16  }
  0xb6   : > { %v518_v7 = vrot.slane %v4175_v5, %v4170_v3  ;;  %v490_v8 = vsel %vm489_vm1, %v488_v6, 0.0  ;;  %v509_v10 = vrot.slane %v4175_v5, %v4182_v9  ;;  %s4731_s25 = sld [smem:[#allocation20_spill]]  ;;  %s2796_s19 = scalar_lea.sflag [#allocation4], %s4149_s3 }
  0xb7   : > { %491 = vadd.xlane.f32.xlu0 %v490_v8  ;;  %p4732_p10 = scmp.ne.s32.totalorder %s4720_s16, 0 }
  0xb8   : > { %520 = vbcast.lane.b32.xlu1 %v518_v7, 256 }
  0xcd   : > { %511 = vbcast.lane.b32.xlu0 %v509_v10, 256 }
 0x12a   : > { %v521_v15 = vpop.permute.xlu1 %520 }
 0x144   : > { %v492_v12 = vpop.xlane.xlu0 %491 }
 0x145   : > { %v4186_v13 = vmul.f32 0.033333335, %v492_v12 }
 0x148   : > { %v512_v14 = vpop.permute.xlu0 %511 }
 0x149   : > { %v514_v16 = vmul.f32 %v512_v14, %v4186_v13 }
 0x14b   : > { %v4189_v17 = vadd.f32 %v521_v15, %v514_v16 }
 0x14d   : > { %v527_v18 = vand.u32 2139095040, %v4189_v17  ;;  %v524_v22 = vand.u32 2147483647, %v4189_v17  ;;  %vm526_vm9 = vcmp.lt.s32.totalorder %v4189_v17, 0  ;;  %vm616_vm14 = vweird.f32 %v4189_v17 }
 0x14f   : > { %v528_v19 = vshrl.u32 %v527_v18, 23  ;;  %v531_v25 = vand.u32 8388607, %v524_v22  ;;  %vm525_vm10 = vcmp.le.f32.partialorder %v524_v22, 0.7853982  ;;  %v503_v22 = vrot.slane %v4175_v5, 1 }
 0x151   : > { %v2927_v20 = vadd.s32 4294967169, %v528_v19  ;;  %v532_v44 = vor.u32 8388608, %v531_v25 }
 0x153   : > { %v534_v21 = vadd.s32 1, %v2927_v20  ;;  %v572_v58 = vshll.u32 %v532_v44, 8  ;;  %v498_v44 = vsub.s32 %v4165_v1, %v4167_v2 }
 0x155   : > { %vm535_vm2 = vcmp.gt.s32.totalorder %v534_v21, 0 }
 0x156   : > { %v536_v23 = vsel %vm535_vm2, %v534_v21, 0  ;;  %vm638_vm2 = vcmp.eq.s32.totalorder %v4165_v1, 31 }
 0x157   : > { %v538_v24 = vand.u32 31, %v536_v23  ;;  %v537_v27 = vshrl.u32 %v536_v23, 5 }
 0x159   : > { %v539_v26 = vsub.s32 32, %v538_v24  ;;  %v541_v29 = vshll.u32 %v3859_v28, %v538_v24  ;;  %v544_v31 = vshll.u32 %v3860_v30, %v538_v24  ;;  %v547_v35 = vshll.u32 %v3861_v33, %v538_v24 }
 0x15a   : > { %v550_v38 = vshll.u32 %v3862_v36, %v538_v24  ;;  %v553_v41 = vshll.u32 %v3863_v39, %v538_v24  ;;  %vm556_vm3 = vcmp.lt.s32.totalorder %v537_v27, 1  ;;  %vm559_vm4 = vcmp.lt.s32.totalorder %v537_v27, 4 }
 0x15b   : > { %v542_v32 = vshrl.u32 %v3860_v30, %v539_v26  ;;  %v545_v34 = vshrl.u32 %v3861_v33, %v539_v26  ;;  %v548_v37 = vshrl.u32 %v3862_v36, %v539_v26  ;;  %v551_v40 = vshrl.u32 %v3863_v39, %v539_v26 }
 0x15c   : > { %v554_v43 = vshrl.u32 %v3864_v42, %v539_v26  ;;  %v540_v53 = vshrl.u32 %v3859_v28, %v539_v26  ;;  %vm558_vm5 = vcmp.lt.s32.totalorder %v537_v27, 3  ;;  %vm557_vm6 = vcmp.lt.s32.totalorder %v537_v27, 2 }
 0x15d   : > { %v543_v45 = vor.u32 %v542_v32, %v541_v29  ;;  %v546_v46 = vor.u32 %v545_v34, %v544_v31  ;;  %v549_v47 = vor.u32 %v548_v37, %v547_v35  ;;  %v552_v48 = vor.u32 %v551_v40, %v550_v38 }
 0x15e   : > { %v555_v49 = vor.u32 %v554_v43, %v553_v41 }
 0x15f   : > { %v561_v50 = vsel %vm559_vm4, %v549_v47, 2102212464  ;;  %v564_v51 = vsel %vm556_vm3, %v543_v45, %v546_v46  ;;  %v568_v52 = vsel %vm556_vm3, %v546_v46, %v549_v47  ;;  %v565_v54 = vsel %vm559_vm4, %v552_v48, 920167782 }
 0x160   : > { %v569_v55 = vsel %vm559_vm4, %v555_v49, 1326507024  ;;  %v566_v56 = vsel %vm558_vm5, %v549_v47, %v565_v54  ;;  %v560_v59 = vsel %vm556_vm3, %v540_v53, %v543_v45  ;;  %v562_v60 = vsel %vm558_vm5, %v546_v46, %v561_v50 }
 0x161   : > { %v570_v57 = vsel %vm558_vm5, %v552_v48, %v569_v55  ;;  %v567_v61 = vsel %vm557_vm6, %v564_v51, %v566_v56  ;;  %v563_v8 = vsel %vm557_vm6, %v560_v59, %v562_v60  ;;  %v499_v46 = vrot.slane %v4186_v13, %v498_v44  ;;  %v1061_v44 = vld [vmem:[#allocation7 + $0x8] sm:$0xff] }
 0x162   : > { %v571_v62 = vsel %vm557_vm6, %v568_v52, %v570_v57  ;;  %v4198_v6 = vmul.u32.u64.low %v572_v58, %v567_v61  ;;  %v4199_v7 = vmul.u32.u64.high %v572_v58, %v567_v61, %v4198_v6  ;;  %v579_v11 = vmul.u32 %v572_v58, %v563_v8  ;;  %v649_v61 = vld [vmem:[%s4689_s2 + $0x10] sm:$0xff] }
 0x163   : > { %v4195_v63 = vmul.u32.u64.low %v572_v58, %v571_v62  ;;  %v4196_v0 = vmul.u32.u64.high %v572_v58, %v571_v62, %v4195_v63  ;;  %v501_v50 = vmul.f32 %v499_v46, %v4175_v5  ;;  %v4216_v13 = vsub.s32 0, %v4167_v2  ;;  %v647_v58 = vld [vmem:[%s4689_s2] sm:$0xff]  ;;  %v648_v5 = vld [vmem:[%s4689_s2 + $0x8] sm:$0xff]  ;;  %v650_v62 = vld [vmem:[%s4689_s2 + $0x18] sm:$0xff] }
 0x164   : > { %v582_v10 = vadd.s32 1, %v4199_v7  ;;  %v3865_v59 = vmov 0.0|0.0   ;;  %v3371_v60 = vpack.c.bf16 %v648_v5, %v647_v58  ;;  %v3374_v63 = vpack.c.bf16 %v650_v62, %v649_v61 }
 0x165   : > { %vm581_vm7 = vc.u32 %v4196_v0, %v4198_v6  ;;  %v580_v26 = vadd.s32 %v4198_v6, %v4196_v0  ;;  %v505_v56 = vadd.f32 %v503_v22, %v501_v50  ;;  %3370 = vmatprep.subr.bf16.mxu1 %v3865_v59  ;;  %v3867_v0 = vmov 0.0  }
 0x166   : > { %v583_v12 = vsel %vm581_vm7, %v582_v10, %v4199_v7  ;;  %3372 = vmatpush3.bf16.msra.mxu1 %v3371_v60  ;;  %3127 = vmatprep.mubr.msk.f32.mxu1 %vm3866_vm15, %v3867_v0  ;;  %vm727_vm3 = vcmask 130048   ;;  %vm802_vm4 = vcmask 64512   ;;  %vm1264_vm5 = vcmask 523264  }
 0x167   : > { %v584_v14 = vadd.s32 %v583_v12, %v579_v11  ;;  %3373 = vmatprep.subr.bf16.mxu1 %v3865_v59  ;;  %3140 = vmatprep.subr.mxu0 %v3867_v0 }
 0x168   : > { %3142 = vmatprep.mubr.msk.f32.mxu0 %vm3866_vm15, %v3867_v0 }
 0x169   : > { %v585_v15 = vadd.s32 536870912, %v584_v14 }
 0x16a   : > { %3375 = vmatpush3.bf16.msra.mxu1 %v3374_v63 }
 0x16b   : > { %v586_v16 = vshrl.u32 %v585_v15, 30  ;;  %3130 = vmatprep.subr.mxu1 %v3867_v0 }
 0x16d   : > { %v587_v18 = vshll.u32 %v586_v16, 30  ;;  %v610_v38 = vsub.s32 4, %v586_v16 }
 0x16f   : > { %v588_v19 = vsub.s32 %v584_v14, %v587_v18  ;;  %v611_v41 = vsel %vm526_vm9, %v610_v38, %v586_v16 }
 0x170   : > { %v613_v43 = vsel %vm525_vm10, 0, %v611_v41 }
 0x171   : > { %v590_v20 = vsub.s32 0, %v588_v19  ;;  %v617_v45 = vadd.s32 3, %v613_v43  ;;  %v1060_v43 = vld [vmem:[#allocation7] sm:$0xff] }
 0x172   : > { %v3377_v46 = vpack.c.bf16 %v1061_v44, %v1060_v43 }
 0x173   : > { %v2928_v21 = vmin.u32 %v590_v20, %v588_v19  ;;  %v618_v47 = vand.u32 3, %v617_v45  ;;  %v1062_v45 = vld [vmem:[#allocation7 + $0x10] sm:$0xff] }
 0x175   : > { %v592_v23 = vclz %v2928_v21  ;;  %vm623_vm11 = vcmp.eq.s32.totalorder %v618_v47, 2  ;;  %vm620_vm12 = vcmp.eq.s32.totalorder %v618_v47, 0  ;;  %vm619_vm13 = vcmp.lt.s32.totalorder %v618_v47, 2  ;;  %v1063_v47 = vld [vmem:[#allocation7 + $0x18] sm:$0xff] }
 0x177   : > { %v2929_v24 = vadd.s32 4294967294, %v592_v23 }
 0x179   : > { %vm2930_vm8 = vcmp.lt.s32.totalorder %v2929_v24, 0 }
 0x17a   : > { %v595_v25 = vsel %vm2930_vm8, 0, %v2929_v24 }
 0x17b   : > { %v596_v27 = vsub.s32 32, %v595_v25  ;;  %v600_v28 = vsub.s32 4294967266, %v595_v25  ;;  %v597_v29 = vshll.u32 %v588_v19, %v595_v25 }
 0x17d   : > { %v598_v30 = vshrl.u32 %v580_v26, %v596_v27  ;;  %v601_v31 = vadd.s32 127, %v600_v28 }
 0x17f   : > { %v599_v32 = vor.u32 %v598_v30, %v597_v29  ;;  %v602_v33 = vshll.u32 %v601_v31, 23 }
 0x181   : > { %v603_v34 = vor.u32 4788187, %v602_v33  ;;  %v606_v36 = vcvt.s32.f32 %v599_v32 }
 0x183   : > { %v604_v35 = vand.u32 2147483647, %v603_v34 }
 0x185   : > { %v607_v37 = vmul.f32 %v606_v36, %v604_v35 }
 0x187   : > { %v608_v39 = vxor.u32 2147483648, %v607_v37 }
 0x189   : > { %v609_v40 = vsel %vm526_vm9, %v608_v39, %v607_v37 }
 0x18a   : > { %v612_v42 = vsel %vm525_vm10, %v4189_v17, %v609_v40  ;;  %v632_v17 = vrot.slane %v505_v56, %v4216_v13 }
 0x18b   : > { %3603 = vcosq.f32 %v612_v42 }
 0x18c   : > { %3605 = vsinq.f32 %v612_v42 }
 0x195   : > { %v3604_v48 = vpop.eup %3603 }
 0x196   : > { %v3606_v49 = vpop.eup %3605  ;;  %v624_v51 = vxor.u32 2147483648, %v3604_v48 }
 0x197   : > { %v621_v52 = vxor.u32 2147483648, %v3606_v49 }
 0x198   : > { %v625_v53 = vsel %vm623_vm11, %v624_v51, %v3606_v49 }
 0x199   : > { %v622_v54 = vsel %vm620_vm12, %v3604_v48, %v621_v52  ;;  %v3380_v48 = vpack.c.bf16 %v1063_v47, %v1062_v45 }
 0x19a   : > { %v626_v55 = vsel %vm619_vm13, %v622_v54, %v625_v53  ;;  %v4285_v54 = vld [vmem:[%s4691_s4] sm:$0x3f] }
 0x19b   : > { %v627_v57 = vsel %vm616_vm14, nan, %v626_v55  ;;  %v1141_v55 = vrot.slane %v4285_v54, %v4216_v13 }
 0x19c   : > { %641 = vperm.xlu1 %3601, %v627_v57  }
 0x1a0   : > { %634 = vbcast.lane.b32.xlu1 %v632_v17, 256 }
 0x21b   : > { %v642_v6 = vpop.permute.xlu1 %641 }
 0x21c   : > { %v644_v11 = vsel %vm638_vm2, %v642_v6, 0.0 }
 0x21f   : > { %v635_v7 = vpop.permute.xlu1 %634 }
 0x220   : > { %v636_v8 = vsel %vm628_vm0, %v635_v7, 0.0  ;;  %v1167_v7 = vld [vmem:[#allocation8] sm:$0xff] }
 0x221   : > { %v637_v10 = vadd.f32 %v636_v8, %v4173_v4  ;;  %v1168_v8 = vld [vmem:[#allocation8 + $0x8] sm:$0xff] }
 0x223   : > { %v4242_v12 = vadd.f32 %v644_v11, %v637_v10  ;;  %v3383_v10 = vpack.c.bf16 %v1168_v8, %v1167_v7  ;;  %v1169_v11 = vld [vmem:[#allocation8 + $0x10] sm:$0xff] }
 0x225   : > { %3128 = vmatmul.mubr.msk.f32.vlgmr.msra.gmra.mrb[0].mxu1 %vm489_vm1, %v4242_v12 }
 0x226   : > { %3132 = vmatprep.mubr.msk.f32.mxu1 %vm3866_vm15, %v3867_v0 }
 0x2f8   : > { %v720_v14 = vpop.f32.mrb[0].mxu1 }
 0x2f9   : > { %725 = vrot.lane.b32.xlu1 %v720_v14, %s3868_s30  ;;  %v3129_v15 = vpop.f32.mrb[1].mxu1 }
 0x2fa   : > { %v1252_v15 = vld [vmem:[%s4694_s7] sm:$0xff] }
 0x2fd   : > { %892 = vrot.lane.b32.xlu1 %v720_v14, %s3869_s15 }
 0x301   : > { %890 = vrot.lane.b32.xlu1 %v720_v14, %s3870_s12 }
 0x36b   : > { %v726_v1 = vpop.permute.xlu1 %725 }
 0x36c   : > { %3131 = vmatpush3.xpose.msk.msra.mxu1 %vm727_vm3, %v726_v1  ;;  %v1253_v1 = vld [vmem:[%s4694_s7 + $0x8] sm:$0xff] }
 0x36d   : > { %3135 = vmatprep.subr.mxu1 %v3867_v0 }
 0x36f   : > { %3133 = vmatmul.mubr.msk.f32.vlgmr.msra.gmra.mrb[2].mxu1 %vm727_vm3, %v720_v14  ;;  %v893_v4 = vpop.permute.xlu1 %892 }
 0x370   : > { %3141 = vmatpush3.xpose.msk.msra.mxu0 %vm727_vm3, %v893_v4  ;;  %3137 = vmatprep.mubr.msk.f32.mxu1 %vm3866_vm15, %v3867_v0  ;;  %v1254_v4 = vld [vmem:[%s4694_s7 + $0x10] sm:$0xff] }
 0x371   : > { %3376 = vmatprep.subr.bf16.mxu0 %v3865_v59 }
 0x373   : > { %v891_v16 = vpop.permute.xlu1 %890 }
 0x374   : > { %3143 = vmatmul.mubr.msk.f32.vlgmr.msra.gmra.mrb[0].mxu0 %vm727_vm3, %v891_v16  ;;  %v3389_v16 = vpack.c.bf16 %v1253_v1, %v1252_v15 }
 0x375   : > { %3158 = vmatprep.mubr.msk.f32.mxu0 %vm3866_vm15, %v3867_v0  ;;  %3378 = vmatpush3.bf16.msra.mxu0 %v3377_v46 }
 0x376   : > { %3379 = vmatprep.subr.bf16.mxu0 %v3865_v59 }
 0x379   : > { %3381 = vmatpush3.bf16.msra.mxu0 %v3380_v48 }
 0x37a   : > { %3388 = vmatprep.subr.bf16.mxu0 %v3865_v59 }
 0x442   : > { %v798_v18 = vpop.f32.mrb[2].mxu1 }
 0x443   : > { %v3134_v19 = vpop.f32.mrb[3].mxu1  ;;  %v803_v20 = vsel %vm802_vm4, %v798_v18, -inf }
 0x444   : > { %804 = vmax.xlane.f32.xlu1 %v803_v20  ;;  %v1256_v20 = vld [vmem:[%s4694_s7 + $0x20] sm:$0xff] }
 0x447   : > { %v964_v21 = vpop.f32.mrb[0].mxu0 }
 0x448   : > { %v3144_v23 = vpop.f32.mrb[1].mxu0  ;;  %v968_v24 = vsel %vm802_vm4, %v964_v21, -inf }
 0x449   : > { %969 = vmax.xlane.f32.xlu0 %v968_v24 }
 0x4d1   : > { %v805_v25 = vpop.xlane.xlu1 %804 }
 0x4d2   : > { %v806_v26 = vsub.f32 %v798_v18, %v805_v25  ;;  %v1255_v18 = vld [vmem:[%s4694_s7 + $0x18] sm:$0xff] }
 0x4d3   : > { %v3392_v19 = vpack.c.bf16 %v1255_v18, %v1254_v4 }
 0x4d4   : > { %v807_v27 = vmul.f32 1.442695, %v806_v26 }
 0x4d6   : > { %3607 = vpow2.f32 %v807_v27  ;;  %v970_v28 = vpop.xlane.xlu0 %969  ;;  %v1159_v27 = vsub.s32 1, %v4167_v2 }
 0x4d7   : > { %v971_v29 = vsub.f32 %v964_v21, %v970_v28  ;;  %v1257_v21 = vld [vmem:[%s4694_s7 + $0x28] sm:$0xff] }
 0x4d8   : > { %v3395_v23 = vpack.c.bf16 %v1257_v21, %v1256_v20  ;;  %v1160_v28 = vrot.slane %v4285_v54, %v1159_v27 }
 0x4d9   : > { %v972_v30 = vmul.f32 1.442695, %v971_v29 }
 0x4db   : > { %3609 = vpow2.f32 %v972_v30  ;;  %v1165_v30 = vrot.slane %v4285_v54, %v4182_v9 }
 0x4e0   : > { %v3608_v31 = vpop.eup %3607 }
 0x4e1   : > { %v809_v32 = vsel %vm802_vm4, %v3608_v31, 0.0 }
 0x4e2   : > { %810 = vadd.xlane.f32.xlu0 %v809_v32 }
 0x4e5   : > { %v3610_v33 = vpop.eup %3609 }
 0x4e6   : > { %v974_v34 = vsel %vm802_vm4, %v3610_v33, 0.0 }
 0x4e7   : > { %975 = vadd.xlane.f32.xlu1 %v974_v34  ;;  %v1258_v34 = vld [vmem:[%s4694_s7 + $0x30] sm:$0xff] }
 0x4f8   : > { %979 = vrot.lane.b32.xlu1 %v720_v14, %s3871_s13  ;;  %814 = vrot.lane.b32.xlu0 %v720_v14, %s4705_s5  ;;  %v1170_v14 = vld [vmem:[#allocation8 + $0x18] sm:$0xff] }
 0x56f   : > { %v811_v35 = vpop.xlane.xlu0 %810 }
 0x570   : > { %3611 = vrcp.f32 %v811_v35  ;;  %v1259_v35 = vld [vmem:[%s4694_s7 + $0x38] sm:$0xff] }
 0x573   : > { %v815_v36 = vpop.permute.xlu0 %814 }
 0x574   : > { %3136 = vmatpush3.msra.mxu1 %v815_v36  ;;  %v976_v37 = vpop.xlane.xlu1 %975  ;;  %v3398_v36 = vpack.c.bf16 %v1259_v35, %v1258_v34 }
 0x575   : > { %3613 = vrcp.f32 %v976_v37  ;;  %3145 = vmatprep.subr.mxu1 %v3867_v0  ;;  %v2939_v37 = vld [vmem:[#allocation10] ss:$0 sm:$0xff] }
 0x578   : > { %v980_v40 = vpop.permute.xlu1 %979 }
 0x57a   : > { %v3612_v38 = vpop.eup %3611 }
 0x57b   : > { %v813_v39 = vmul.f32 %v3612_v38, %v3608_v31 }
 0x57d   : > { %3138 = vmatmul.mubr.msk.f32.vlgmr.msra.gmra.mrb[4].mxu1 %vm802_vm4, %v813_v39 }
 0x57e   : > { %3146 = vmatpush3.msra.mxu1 %v980_v40  ;;  %3147 = vmatprep.mubr.msk.f32.mxu1 %vm3866_vm15, %v3867_v0 }
 0x57f   : > { %v3614_v41 = vpop.eup %3613  ;;  %3382 = vmatprep.subr.bf16.mxu1 %v3865_v59 }
 0x580   : > { %v978_v42 = vmul.f32 %v3614_v41, %v3610_v33 }
 0x582   : > { %3148 = vmatmul.mubr.msk.f32.vlgmr.msra.gmra.mrb[6].mxu1 %vm802_vm4, %v978_v42  ;;  %v1263_v42 = vrot.slane %v4285_v54, %v4170_v3 }
 0x583   : > { %3169 = vmatprep.mubr.msk.f32.mxu1 %vm3866_vm15, %v3867_v0  ;;  %3384 = vmatpush3.bf16.msra.mxu1 %v3383_v10 }
 0x584   : > { %3385 = vmatprep.subr.bf16.mxu1 %v3865_v59 }
 0x650   : > { %v886_v49 = vpop.f32.mrb[4].mxu1 }
 0x651   : > { %v3139_v50 = vpop.f32.mrb[5].mxu1 }
 0x655   : > { %v1051_v51 = vpop.f32.mrb[6].mxu1 }
 0x656   : > { %1056 = vrot.lane.b32.xlu1 %v1051_v51, %s4704_s28  ;;  %v3149_v22 = vpop.f32.mrb[7].mxu1 }
 0x6c8   : > { %v1057_v52 = vpop.permute.xlu1 %1056 }
 0x6c9   : > { %v1059_v53 = vsel %vm727_vm3, %v886_v49, %v1057_v52 }
 0x6ca   : > { %3159 = vmatmul.mubr.msk.f32.vlgmr.msra.gmra.mrb[2].mxu0 %vm489_vm1, %v1059_v53  ;;  %v2943_v53 = vld [vmem:[%s4689_s2 + $0x20] sm:$0xff] }
 0x6cb   : > { %3188 = vmatprep.mubr.msk.f32.mxu0 %vm3866_vm15, %v3867_v0  ;;  %3390 = vmatpush3.bf16.msra.mxu0 %v3389_v16 }
 0x6cc   : > { %3391 = vmatprep.subr.bf16.mxu0 %v3865_v59 }
 0x6cf   : > { %3393 = vmatpush3.bf16.msra.mxu0 %v3392_v19 }
 0x6d0   : > { %3394 = vmatprep.subr.bf16.mxu0 %v3865_v59 }
 0x6d3   : > { %3396 = vmatpush3.bf16.msra.mxu0 %v3395_v23 }
 0x6d4   : > { %3397 = vmatprep.subr.bf16.mxu0 %v3865_v59 }
 0x6d7   : > { %3399 = vmatpush3.bf16.msra.mxu0 %v3398_v36 }
 0x6d8   : > { %3212 = vmatprep.subr.mxu0 %v3867_v0 }
 0x79d   : > { %v1133_v56 = vpop.f32.mrb[2].mxu0 }
 0x79e   : > { %v1137_v57 = vadd.f32 %v1133_v56, %v4242_v12  ;;  %v3160_v58 = vpop.f32.mrb[3].mxu0  ;;  %v3386_v12 = vpack.c.bf16 %v1170_v14, %v1169_v11 }
 0x79f   : > { %v2946_v58 = vld [vmem:[%s4689_s2 + $0x38] sm:$0xff] }
 0x7a0   : > { %v1142_v5 = vadd.f32 %v1141_v55, %v1137_v57  ;;  %3387 = vmatpush3.bf16.msra.mxu1 %v3386_v12  ;;  %v2944_v55 = vld [vmem:[%s4689_s2 + $0x28] sm:$0xff]  ;;  %v2945_v57 = vld [vmem:[%s4689_s2 + $0x30] sm:$0xff] }
 0x7a1   : > { %3400 = vmatprep.subr.bf16.mxu1 %v3865_v59  ;;  %v3401_v56 = vpack.c.bf16 %v2944_v55, %v2943_v53  ;;  %v4403_v55 = vld [vmem:[%s4691_s4 + $0x8] sm:$0x3f] }
 0x7a2   : > { %v1143_v60 = vsel %vm489_vm1, %v1142_v5, 0.0 }
 0x7a3   : > { %1144 = vadd.xlane.f32.xlu0 %v1143_v60 }
 0x830   : > { %v1145_v17 = vpop.xlane.xlu0 %1144 }
 0x831   : > { %v1147_v61 = vmul.f32 0.03125, %v1145_v17 }
 0x833   : > { %v1148_v62 = vsub.f32 %v1142_v5, %v1147_v61  ;;  %v3404_v5 = vpack.c.bf16 %v2946_v58, %v2945_v57 }
 0x835   : > { %v1149_v63 = vmul.f32 %v1148_v62, %v1148_v62 }
 0x837   : > { %v1150_v6 = vsel %vm489_vm1, %v1149_v63, 0.0  ;;  %v1360_v63 = vsub.s32 5, %v4167_v2 }
 0x838   : > { %1151 = vadd.xlane.f32.xlu1 %v1150_v6 }
 0x839   : > { %v1361_v10 = vrot.slane %v4285_v54, %v1360_v63 }
 0x8c5   : > { %v1152_v24 = vpop.xlane.xlu1 %1151 }
 0x8c6   : > { %v1153_v25 = vmul.f32 0.03125, %v1152_v24 }
 0x8c8   : > { %v1154_v26 = vadd.f32 1e-06, %v1153_v25 }
 0x8ca   : > { %3615 = vrsqrt.f32 %v1154_v26 }
 0x8d4   : > { %v3616_v29 = vpop.eup %3615 }
 0x8d5   : > { %v1156_v31 = vmul.f32 %v3616_v29, %v1148_v62  ;;  %v1355_v62 = vsub.s32 4, %v4167_v2  ;;  %v2083_v2 = vld [vmem:[%s4695_s8 + $0x8] sm:$0xff] }
 0x8d7   : > { %v1161_v32 = vmul.f32 %v1160_v28, %v1156_v31  ;;  %v1356_v6 = vrot.slane %v4285_v54, %v1355_v62 }
 0x8d9   : > { %v1166_v33 = vadd.f32 %v1165_v30, %v1161_v32 }
 0x8db   : > { %3170 = vmatmul.mubr.msk.f32.vlgmr.msra.gmra.mrb[8].mxu1 %vm489_vm1, %v1166_v33 }
 0x8dc   : > { %3199 = vmatprep.mubr.msk.f32.mxu1 %vm3866_vm15, %v3867_v0  ;;  %3402 = vmatpush3.bf16.msra.mxu1 %v3401_v56  ;;  %v1859_v56 = vrot.slane %v4403_v55, %v4216_v13  ;;  %v1887_v13 = vld [vmem:[#allocation8 + $0x30] sm:$0xff] }
 0x8dd   : > { %3403 = vmatprep.subr.bf16.mxu1 %v3865_v59 }
 0x8e0   : > { %3405 = vmatpush3.bf16.msra.mxu1 %v3404_v5 }
 0x8e1   : > { %3202 = vmatprep.subr.mxu1 %v3867_v0 }
 0x9ae   : > { %v1247_v38 = vpop.f32.mrb[8].mxu1 }
 0x9af   : > { %v1248_v39 = vadd.f32 %v2939_v37, %v1247_v38  ;;  %v3171_v40 = vpop.f32.mrb[9].mxu1 }
 0x9b1   : > { %v1251_v41 = vmax.f32 %v1248_v39, 0.0 }
 0x9b3   : > { %3189 = vmatmul.mubr.msk.f32.vlgmr.msra.gmra.mrb[4].mxu0 %vm1264_vm5, %v1251_v41 }
 0x9b4   : > { %3214 = vmatprep.mubr.msk.f32.mxu0 %vm3866_vm15, %v3867_v0 }
 0xa86   : > { %v1334_v43 = vpop.f32.mrb[4].mxu0 }
 0xa87   : > { %v1335_v44 = vadd.f32 %v1334_v43, %v1263_v42  ;;  %v3190_v45 = vpop.f32.mrb[5].mxu0  ;;  %v1778_v43 = vld [vmem:[#allocation7 + $0x20] sm:$0xff] }
 0xa88   : > { %v1780_v45 = vld [vmem:[#allocation7 + $0x30] sm:$0xff] }
 0xa89   : > { %v1338_v46 = vmax.f32 %v1335_v44, 0.0  ;;  %v1779_v44 = vld [vmem:[#allocation7 + $0x28] sm:$0xff] }
 0xa8b   : > { %v1339_v47 = vadd.f32 %v1338_v46, %v1166_v33  ;;  %v3407_v46 = vpack.c.bf16 %v1779_v44, %v1778_v43 }
 0xa8d   : > { %v1340_v48 = vsel %vm489_vm1, %v1339_v47, 0.0 }
 0xa8e   : > { %1341 = vadd.xlane.f32.xlu0 %v1340_v48 }
 0xb1b   : > { %v1342_v49 = vpop.xlane.xlu0 %1341 }
 0xb1c   : > { %v1343_v50 = vmul.f32 0.03125, %v1342_v49 }
 0xb1e   : > { %v1344_v51 = vsub.f32 %v1339_v47, %v1343_v50  ;;  %v1781_v47 = vld [vmem:[#allocation7 + $0x38] sm:$0xff] }
 0xb1f   : > { %v3410_v48 = vpack.c.bf16 %v1781_v47, %v1780_v45 }
 0xb20   : > { %v1345_v22 = vmul.f32 %v1344_v51, %v1344_v51 }
 0xb22   : > { %v1346_v52 = vsel %vm489_vm1, %v1345_v22, 0.0 }
 0xb23   : > { %1347 = vadd.xlane.f32.xlu0 %v1346_v52 }
 0xbb0   : > { %v1348_v60 = vpop.xlane.xlu0 %1347 }
 0xbb1   : > { %v1349_v17 = vmul.f32 0.03125, %v1348_v60 }
 0xbb3   : > { %v1350_v61 = vadd.f32 1e-06, %v1349_v17 }
 0xbb5   : > { %3617 = vrsqrt.f32 %v1350_v61 }
 0xbbf   : > { %v3618_v7 = vpop.eup %3617 }
 0xbc0   : > { %v1352_v8 = vmul.f32 %v3618_v7, %v1344_v51 }
 0xbc2   : > { %v1357_v11 = vmul.f32 %v1356_v6, %v1352_v8 }
 0xbc4   : > { %v4360_v14 = vadd.f32 %v1361_v10, %v1357_v11  ;;  %v1885_v11 = vld [vmem:[#allocation8 + $0x20] sm:$0xff] }
 0xbc6   : > { %3200 = vmatmul.mubr.msk.f32.vlgmr.msra.gmra.mrb[10].mxu1 %vm489_vm1, %v4360_v14 }
 0xbc7   : > { %3204 = vmatprep.mubr.msk.f32.mxu1 %vm3866_vm15, %v3867_v0 }
 0xc99   : > { %v1439_v12 = vpop.f32.mrb[10].mxu1 }
 0xc9a   : > { %1609 = vrot.lane.b32.xlu0 %v1439_v12, %s3869_s15  ;;  %1444 = vrot.lane.b32.xlu1 %v1439_v12, %s3868_s30  ;;  %v3201_v15 = vpop.f32.mrb[11].mxu1  ;;  %s4728_s30 = smov 64   ;;  %s4729_s15 = smov 16  }
 0xc9e   : > { %1607 = vrot.lane.b32.xlu1 %v1439_v12, %s3870_s12  ;;  %s483_s12 = scalar_lea.vmem [#allocation11], %s4149_s3 }
 0xd0c   : > { %v1610_v1 = vpop.permute.xlu0 %1609  ;;  %v1445_v4 = vpop.permute.xlu1 %1444 }
 0xd0d   : > { %3203 = vmatpush3.xpose.msk.msra.mxu1 %vm727_vm3, %v1445_v4  ;;  %3213 = vmatpush3.xpose.msk.msra.mxu0 %vm727_vm3, %v1610_v1  ;;  %v2957_v4 = vld [vmem:[%s4694_s7 + $0x40] sm:$0xff] }
 0xd0e   : > { %3207 = vmatprep.subr.mxu1 %v3867_v0  ;;  %3406 = vmatprep.subr.bf16.mxu0 %v3865_v59 }
 0xd10   : > { %3205 = vmatmul.mubr.msk.f32.vlgmr.msra.gmra.mrb[12].mxu1 %vm727_vm3, %v1439_v12  ;;  %v1608_v54 = vpop.permute.xlu1 %1607 }
 0xd11   : > { %3215 = vmatmul.mubr.msk.f32.vlgmr.msra.gmra.mrb[6].mxu0 %vm727_vm3, %v1608_v54  ;;  %3209 = vmatprep.mubr.msk.f32.mxu1 %vm3866_vm15, %v3867_v0  ;;  %v2958_v54 = vld [vmem:[%s4694_s7 + $0x48] sm:$0xff] }
 0xd12   : > { %3230 = vmatprep.mubr.msk.f32.mxu0 %vm3866_vm15, %v3867_v0  ;;  %3408 = vmatpush3.bf16.msra.mxu0 %v3407_v46 }
 0xd13   : > { %3409 = vmatprep.subr.bf16.mxu0 %v3865_v59 }
 0xd16   : > { %3411 = vmatpush3.bf16.msra.mxu0 %v3410_v48 }
 0xd17   : > { %3418 = vmatprep.subr.bf16.mxu0 %v3865_v59 }
 0xde3   : > { %v1516_v16 = vpop.f32.mrb[12].mxu1 }
 0xde4   : > { %v3206_v18 = vpop.f32.mrb[13].mxu1  ;;  %v1681_v19 = vpop.f32.mrb[6].mxu0  ;;  %v1520_v20 = vsel %vm802_vm4, %v1516_v16, -inf }
 0xde5   : > { %v3216_v21 = vpop.f32.mrb[7].mxu0  ;;  %1521 = vmax.xlane.f32.xlu1 %v1520_v20  ;;  %v1685_v23 = vsel %vm802_vm4, %v1681_v19, -inf  ;;  %v3419_v18 = vpack.c.bf16 %v2958_v54, %v2957_v4  ;;  %v2976_v54 = vld [vmem:[%s4695_s8 + $0x68] sm:$0xff] }
 0xde6   : > { %1686 = vmax.xlane.f32.xlu0 %v1685_v23  ;;  %v2961_v21 = vld [vmem:[%s4694_s7 + $0x60] sm:$0xff]  ;;  %v2962_v23 = vld [vmem:[%s4694_s7 + $0x68] sm:$0xff] }
 0xe72   : > { %v1522_v24 = vpop.xlane.xlu1 %1521 }
 0xe73   : > { %v1523_v25 = vsub.f32 %v1516_v16, %v1522_v24  ;;  %v1687_v26 = vpop.xlane.xlu0 %1686  ;;  %v2959_v16 = vld [vmem:[%s4694_s7 + $0x50] sm:$0xff]  ;;  %v3425_v24 = vpack.c.bf16 %v2962_v23, %v2961_v21  ;;  %v2978_v21 = vld [vmem:[%s4695_s8 + $0x78] sm:$0xff] }
 0xe74   : > { %v1688_v28 = vsub.f32 %v1681_v19, %v1687_v26  ;;  %v2960_v19 = vld [vmem:[%s4694_s7 + $0x58] sm:$0xff]  ;;  %v2084_v23 = vld [vmem:[%s4695_s8 + $0x10] sm:$0xff] }
 0xe75   : > { %v1524_v29 = vmul.f32 1.442695, %v1523_v25  ;;  %v3422_v20 = vpack.c.bf16 %v2960_v19, %v2959_v16  ;;  %v2082_v16 = vld [vmem:[%s4695_s8] sm:$0xff] }
 0xe76   : > { %v1689_v30 = vmul.f32 1.442695, %v1688_v28 }
 0xe77   : > { %3619 = vpow2.f32 %v1524_v29  ;;  %v1877_v29 = vrot.slane %v4403_v55, %v1159_v27  ;;  %v2964_v27 = vld [vmem:[%s4694_s7 + $0x78] sm:$0xff] }
 0xe78   : > { %3621 = vpow2.f32 %v1689_v30 }
 0xe81   : > { %v3620_v31 = vpop.eup %3619 }
 0xe82   : > { %v3622_v32 = vpop.eup %3621  ;;  %v1526_v33 = vsel %vm802_vm4, %v3620_v31, 0.0 }
 0xe83   : > { %1527 = vadd.xlane.f32.xlu0 %v1526_v33  ;;  %v1691_v34 = vsel %vm802_vm4, %v3622_v32, 0.0 }
 0xe84   : > { %1692 = vadd.xlane.f32.xlu1 %v1691_v34 }
 0xe95   : > { %1696 = vrot.lane.b32.xlu1 %v1439_v12, %s3871_s13  ;;  %s2808_s13 = sshll.u32 %s483_s12, 4  ;;  %s4645_s13 = int_to_ptr.vmem [resolvable:$true] %s2808_s13 }
 0xe96   : > { %s3773_s20 = scalar_lea.vmem %s4645_s13, 16 }
 0xe97   : > { %p3774_p6 = scmp.ne.s32.totalorder %s4645_s13, %s3773_s20 }
 0xe99   : > { %1531 = vrot.lane.b32.xlu0 %v1439_v12, %s4728_s30  ;;  %v1886_v12 = vld [vmem:[#allocation8 + $0x28] sm:$0xff]  ;;  %s4730_s30 = sld [smem:[#allocation19_spill]]  ;;  %p3775_p11 = pnand %p3774_p6, %p4732_p10 }
 0xe9a   : > { %v3413_v15 = vpack.c.bf16 %v1886_v12, %v1885_v11  ;;  %v2075_v12 = vrot.slane %v4403_v55, %v1355_v62 }
 0xe9b   : > { %p3776_p12 = pneg %p3775_p11 }
 0xf10   : > { %v1528_v35 = vpop.xlane.xlu0 %1527 }
 0xf11   : > { %3623 = vrcp.f32 %v1528_v35  ;;  %v1693_v36 = vpop.xlane.xlu1 %1692  ;;  %v2963_v35 = vld [vmem:[%s4694_s7 + $0x70] sm:$0xff] }
 0xf12   : > { %3625 = vrcp.f32 %v1693_v36  ;;  %v3428_v36 = vpack.c.bf16 %v2964_v27, %v2963_v35  ;;  %v2996_v27 = vld [vmem:[%s4695_s8 + $0xf8] sm:$0xff] }
 0xf14   : > { %v1532_v37 = vpop.permute.xlu0 %1531 }
 0xf15   : > { %3208 = vmatpush3.msra.mxu1 %v1532_v37  ;;  %v1697_v41 = vpop.permute.xlu1 %1696 }
 0xf16   : > { %3217 = vmatprep.subr.mxu1 %v3867_v0 }
 0xf1b   : > { %v3624_v38 = vpop.eup %3623 }
 0xf1c   : > { %v1530_v39 = vmul.f32 %v3624_v38, %v3620_v31  ;;  %v3626_v40 = vpop.eup %3625  ;;  %v1882_v31 = vrot.slane %v4403_v55, %v4182_v9  ;;  %v2955_v9 = vld [vmem:[#allocation10 + $0x1] ss:$0 sm:$0xff] }
 0xf1d   : > { %v1695_v42 = vmul.f32 %v3626_v40, %v3622_v32 }
 0xf1e   : > { %3210 = vmatmul.mubr.msk.f32.vlgmr.msra.gmra.mrb[14].mxu1 %vm802_vm4, %v1530_v39 }
 0xf1f   : > { %3218 = vmatpush3.msra.mxu1 %v1697_v41  ;;  %3219 = vmatprep.mubr.msk.f32.mxu1 %vm3866_vm15, %v3867_v0  ;;  %v1983_v41 = vrot.slane %v4403_v55, %v4170_v3  ;;  %v2967_v3 = vld [vmem:[%s4695_s8 + $0x28] sm:$0xff] }
 0xf20   : > { %3412 = vmatprep.subr.bf16.mxu1 %v3865_v59 }
 0xf22   : > { %3220 = vmatmul.mubr.msk.f32.vlgmr.msra.gmra.mrb[16].mxu1 %vm802_vm4, %v1695_v42 }
 0xf23   : > { %3241 = vmatprep.mubr.msk.f32.mxu1 %vm3866_vm15, %v3867_v0  ;;  %3414 = vmatpush3.bf16.msra.mxu1 %v3413_v15 }
 0xf24   : > { %3415 = vmatprep.subr.bf16.mxu1 %v3865_v59 }
 0xff1   : > { %v1603_v49 = vpop.f32.mrb[14].mxu1 }
 0xff2   : > { %v3211_v50 = vpop.f32.mrb[15].mxu1 }
 0xff5   : > { %v1768_v51 = vpop.f32.mrb[16].mxu1 }
 0xff6   : > { %1773 = vrot.lane.b32.xlu1 %v1768_v51, %s4729_s15  ;;  %v3221_v22 = vpop.f32.mrb[17].mxu1  ;;  %s3003_s15 = sshll.u32 %s3961_s27, 4  ;;  %s3874_s27 = smov [#allocation11]  }
 0xff7   : > { %s4643_s1 = scalar_lea.hbm %s4731_s25, %s3003_s15  ;;  %s3777_s5 = sshll.u32 %s3874_s27, 4  ;;  %s3778_s5 = int_to_ptr.vmem [resolvable:$false] %s3777_s5 }
 0xff8   : > { %s3779_s28 = scalar_lea.vmem %s3778_s5, 32  ;;  %p3780_p5 = scmp.lt.s32.totalorder %s4645_s13, %s3778_s5 }
 0xff9   : > { %p3781_p7 = scmp.lt.s32.totalorder %s3779_s28, %s3773_s20 }
 0xffb   : > { %p3782_p4 = por %p3781_p7, %p3780_p5 }
 0xffd   : > { %p3783_p1 = pnand %p3782_p4, %p3776_p12 }
0x1068   : > { %v1774_v52 = vpop.permute.xlu1 %1773 }
0x1069   : > { %v1776_v53 = vsel %vm727_vm3, %v1603_v49, %v1774_v52  ;;  %v2966_v52 = vld [vmem:[%s4695_s8 + $0x20] sm:$0xff] }
0x106a   : > { %3231 = vmatmul.mubr.msk.f32.vlgmr.msra.gmra.mrb[8].mxu0 %vm489_vm1, %v1776_v53  ;;  %v2984_v53 = vld [vmem:[%s4695_s8 + $0xa0] sm:$0xff] }
0x106b   : > { %3260 = vmatprep.mubr.msk.f32.mxu0 %vm3866_vm15, %v3867_v0  ;;  %3420 = vmatpush3.bf16.msra.mxu0 %v3419_v18  ;;  %v2977_v18 = vld [vmem:[%s4695_s8 + $0x70] sm:$0xff] }
0x106c   : > { %3421 = vmatprep.subr.bf16.mxu0 %v3865_v59 }
0x106f   : > { %3423 = vmatpush3.bf16.msra.mxu0 %v3422_v20 }
0x1070   : > { %3424 = vmatprep.subr.bf16.mxu0 %v3865_v59 }
0x1073   : > { %3426 = vmatpush3.bf16.msra.mxu0 %v3425_v24  ;;  %v2085_v24 = vld [vmem:[%s4695_s8 + $0x18] sm:$0xff] }
0x1074   : > { %3427 = vmatprep.subr.bf16.mxu0 %v3865_v59 }
0x1077   : > { %3429 = vmatpush3.bf16.msra.mxu0 %v3428_v36  ;;  %v2982_v36 = vld [vmem:[%s4695_s8 + $0x90] sm:$0xff] }
0x1078   : > { %3442 = vmatprep.subr.bf16.mxu0 %v3865_v59 }
0x113d   : > { %v1851_v57 = vpop.f32.mrb[8].mxu0 }
0x113e   : > { %v1855_v58 = vadd.f32 %v1851_v57, %v4360_v14  ;;  %v3232_v5 = vpop.f32.mrb[9].mxu0  ;;  %v1888_v14 = vld [vmem:[#allocation8 + $0x38] sm:$0xff] }
0x113f   : > { %v3416_v1 = vpack.c.bf16 %v1888_v14, %v1887_v13  ;;  %v2985_v57 = vld [vmem:[%s4695_s8 + $0xa8] sm:$0xff]  ;;  %v2968_v5 = vld [vmem:[%s4695_s8 + $0x30] sm:$0xff]  ;;  %v2080_v13 = vrot.slane %v4403_v55, %v1360_v63  ;;  %v3455_v55 = vpack.c.bf16 %v2083_v2, %v2082_v16 }
0x1140   : > { %v1860_v60 = vadd.f32 %v1859_v56, %v1855_v58  ;;  %v3431_v56 = vpack.c.bf16 %v2967_v3, %v2966_v52  ;;  %v3443_v58 = vpack.c.bf16 %v2985_v57, %v2984_v53  ;;  %v2711_v53 = vld [vmem:[%s4697_s10] sm:$0xff] }
0x1141   : > { %3417 = vmatpush3.bf16.msra.mxu1 %v3416_v1  ;;  %v2975_v1 = vld [vmem:[%s4695_s8 + $0x60] sm:$0xff] }
0x1142   : > { %v1861_v17 = vsel %vm489_vm1, %v1860_v60, 0.0  ;;  %3430 = vmatprep.subr.bf16.mxu1 %v3865_v59  ;;  %v3437_v63 = vpack.c.bf16 %v2976_v54, %v2975_v1 }
0x1143   : > { %1862 = vadd.xlane.f32.xlu0 %v1861_v17  ;;  %v2986_v17 = vld [vmem:[%s4695_s8 + $0xb0] sm:$0xff] }
0x11d0   : > { %v1863_v61 = vpop.xlane.xlu0 %1862 }
0x11d1   : > { %v1864_v6 = vmul.f32 0.03125, %v1863_v61 }
0x11d3   : > { %v1865_v7 = vsub.f32 %v1860_v60, %v1864_v6  ;;  %v2969_v60 = vld [vmem:[%s4695_s8 + $0x38] sm:$0xff] }
0x11d4   : > { %v3434_v61 = vpack.c.bf16 %v2969_v60, %v2968_v5  ;;  %v2987_v6 = vld [vmem:[%s4695_s8 + $0xb8] sm:$0xff]  ;;  %v2715_v60 = vld [vmem:[%s4697_s10 + $0x20] sm:$0xff] }
0x11d5   : > { %v1866_v8 = vmul.f32 %v1865_v7, %v1865_v7 }
0x11d7   : > { %v1867_v10 = vsel %vm489_vm1, %v1866_v8, 0.0 }
0x11d8   : > { %1868 = vadd.xlane.f32.xlu1 %v1867_v10 }
0x1265   : > { %v1869_v25 = vpop.xlane.xlu1 %1868 }
0x1266   : > { %v1870_v26 = vmul.f32 0.03125, %v1869_v25  ;;  %v3440_v25 = vpack.c.bf16 %v2978_v21, %v2977_v18 }
0x1268   : > { %v1871_v28 = vadd.f32 1e-06, %v1870_v26  ;;  %v3458_v26 = vpack.c.bf16 %v2085_v24, %v2084_v23 }
0x126a   : > { %3627 = vrsqrt.f32 %v1871_v28  ;;  %v2993_v28 = vld [vmem:[%s4695_s8 + $0xe0] sm:$0xff] }
0x1274   : > { %v3628_v30 = vpop.eup %3627 }
0x1275   : > { %v1873_v32 = vmul.f32 %v3628_v30, %v1865_v7  ;;  %v3446_v7 = vpack.c.bf16 %v2987_v6, %v2986_v17  ;;  %v2980_v30 = vld [vmem:[%s4695_s8 + $0x80] sm:$0xff]  ;;  %v2716_v17 = vld [vmem:[%s4697_s10 + $0x28] sm:$0xff]  ;;  %v2717_v6 = vld [vmem:[%s4697_s10 + $0x30] sm:$0xff] }
0x1277   : > { %v1878_v33 = vmul.f32 %v1877_v29, %v1873_v32  ;;  %v2994_v29 = vld [vmem:[%s4695_s8 + $0xe8] sm:$0xff] }
0x1278   : > { %v3449_v32 = vpack.c.bf16 %v2994_v29, %v2993_v28 }
0x1279   : > { %v1883_v34 = vadd.f32 %v1882_v31, %v1878_v33  ;;  %v2981_v31 = vld [vmem:[%s4695_s8 + $0x88] sm:$0xff] }
0x127a   : > { %v3467_v33 = vpack.c.bf16 %v2981_v31, %v2980_v30  ;;  %v2719_v31 = vld [vmem:[%s4730_s30] sm:$0x1] }
0x127b   : > { %3242 = vmatmul.mubr.msk.f32.vlgmr.msra.gmra.mrb[18].mxu1 %vm489_vm1, %v1883_v34 }
0x127c   : > { %3271 = vmatprep.mubr.msk.f32.mxu1 %vm3866_vm15, %v3867_v0  ;;  %3432 = vmatpush3.bf16.msra.mxu1 %v3431_v56  ;;  %v2712_v56 = vld [vmem:[%s4697_s10 + $0x8] sm:$0xff] }
0x127d   : > { %3433 = vmatprep.subr.bf16.mxu1 %v3865_v59  ;;  %v3479_v57 = vpack.c.bf16 %v2712_v56, %v2711_v53 }
0x1280   : > { %3435 = vmatpush3.bf16.msra.mxu1 %v3434_v61  ;;  %v3485_v61 = vpack.c.bf16 %v2716_v17, %v2715_v60 }
0x1281   : > { %3436 = vmatprep.subr.bf16.mxu1 %v3865_v59 }
0x134e   : > { %v1966_v37 = vpop.f32.mrb[18].mxu1 }
0x134f   : > { %v1967_v38 = vadd.f32 %v2955_v9, %v1966_v37  ;;  %v3243_v39 = vpop.f32.mrb[19].mxu1  ;;  %v2983_v9 = vld [vmem:[%s4695_s8 + $0x98] sm:$0xff] }
0x1350   : > { %v2971_v39 = vld [vmem:[%s4695_s8 + $0x40] sm:$0xff] }
0x1351   : > { %v1970_v40 = vmax.f32 %v1967_v38, 0.0  ;;  %v3470_v38 = vpack.c.bf16 %v2983_v9, %v2982_v36 }
0x1353   : > { %3261 = vmatmul.mubr.msk.f32.vlgmr.msra.gmra.mrb[10].mxu0 %vm1264_vm5, %v1970_v40  ;;  %v2972_v40 = vld [vmem:[%s4695_s8 + $0x48] sm:$0xff] }
0x1354   : > { %3293 = vmatprep.mubr.msk.f32.mxu0 %vm3866_vm15, %v3867_v0  ;;  %3444 = vmatpush3.bf16.msra.mxu0 %v3443_v58  ;;  %v2714_v58 = vld [vmem:[%s4697_s10 + $0x18] sm:$0xff] }
0x1355   : > { %3445 = vmatprep.subr.bf16.mxu0 %v3865_v59 }
0x1358   : > { %3447 = vmatpush3.bf16.msra.mxu0 %v3446_v7  ;;  %v2718_v7 = vld [vmem:[%s4697_s10 + $0x38] sm:$0xff] }
0x1359   : > { %3454 = vmatprep.subr.bf16.mxu0 %v3865_v59 }
0x1426   : > { %v2053_v42 = vpop.f32.mrb[10].mxu0 }
0x1427   : > { %v2054_v43 = vadd.f32 %v2053_v42, %v1983_v41  ;;  %v3262_v44 = vpop.f32.mrb[11].mxu0  ;;  %v3461_v41 = vpack.c.bf16 %v2972_v40, %v2971_v39 }
0x1428   : > { %v2973_v44 = vld [vmem:[%s4695_s8 + $0x50] sm:$0xff] }
0x1429   : > { %v2057_v45 = vmax.f32 %v2054_v43, 0.0 }
0x142b   : > { %v2058_v46 = vadd.f32 %v2057_v45, %v1883_v34  ;;  %v2995_v34 = vld [vmem:[%s4695_s8 + $0xf0] sm:$0xff]  ;;  %v2974_v45 = vld [vmem:[%s4695_s8 + $0x58] sm:$0xff] }
0x142c   : > { %v3452_v37 = vpack.c.bf16 %v2996_v27, %v2995_v34 }
0x142d   : > { %v2059_v47 = vsel %vm489_vm1, %v2058_v46, 0.0 }
0x142e   : > { %2060 = vadd.xlane.f32.xlu0 %v2059_v47  ;;  %v2989_v47 = vld [vmem:[%s4695_s8 + $0xc0] sm:$0xff] }
0x14bb   : > { %v2061_v48 = vpop.xlane.xlu0 %2060 }
0x14bc   : > { %v2062_v49 = vmul.f32 0.03125, %v2061_v48  ;;  %v2990_v48 = vld [vmem:[%s4695_s8 + $0xc8] sm:$0xff] }
0x14be   : > { %v2063_v50 = vsub.f32 %v2058_v46, %v2062_v49  ;;  %v3464_v46 = vpack.c.bf16 %v2974_v45, %v2973_v44  ;;  %v3473_v49 = vpack.c.bf16 %v2990_v48, %v2989_v47 }
0x14c0   : > { %v2064_v51 = vmul.f32 %v2063_v50, %v2063_v50 }
0x14c2   : > { %v2065_v22 = vsel %vm489_vm1, %v2064_v51, 0.0  ;;  %v2991_v51 = vld [vmem:[%s4695_s8 + $0xd0] sm:$0xff] }
0x14c3   : > { %2066 = vadd.xlane.f32.xlu0 %v2065_v22  ;;  %v2992_v22 = vld [vmem:[%s4695_s8 + $0xd8] sm:$0xff] }
0x14c4   : > { %v3476_v52 = vpack.c.bf16 %v2992_v22, %v2991_v51 }
0x1550   : > { %v2067_v8 = vpop.xlane.xlu0 %2066 }
0x1551   : > { %v2068_v10 = vmul.f32 0.03125, %v2067_v8  ;;  %v3488_v8 = vpack.c.bf16 %v2718_v7, %v2717_v6 }
0x1553   : > { %v2069_v11 = vadd.f32 1e-06, %v2068_v10 }
0x1555   : > { %3629 = vrsqrt.f32 %v2069_v11 }
0x155f   : > { %v3630_v15 = vpop.eup %3629 }
0x1560   : > { %v2071_v14 = vmul.f32 %v3630_v15, %v2063_v50 }
0x1562   : > { %v2076_v4 = vmul.f32 %v2075_v12, %v2071_v14 }
0x1564   : > { %v4501_v62 = vadd.f32 %v2080_v13, %v2076_v4 }
0x1566   : > { %v2092_v19 = vrot.slane %v4501_v62, 1  ;;  %v2258_v20 = vrot.slane %v4501_v62, 5  ;;  %v2175_v35 = vrot.slane %v4501_v62, 3  ;;  %v2341_v42 = vrot.slane %v4501_v62, 7 }
0x1567   : > { %v2559_v43 = vrot.slane %v4501_v62, 4  ;;  %v2486_v50 = vrot.slane %v4501_v62, 2  ;;  %v2632_v3 = vrot.slane %v4501_v62, 6 }
0x1568   : > { %3272 = vmatmul.mubr.msk.f32.vlgmr.msra.gmra.mrb[20].mxu1 %vm489_vm1, %v2092_v19  ;;  %3294 = vmatmul.mubr.msk.f32.vlgmr.msra.gmra.mrb[12].mxu0 %vm489_vm1, %v2258_v20 }
0x1569   : > { %3438 = vmatpush3.bf16.msra.mxu1 %v3437_v63  ;;  %3456 = vmatpush3.bf16.msra.mxu0 %v3455_v55 }
0x156a   : > { %3439 = vmatprep.subr.bf16.mxu1 %v3865_v59  ;;  %3457 = vmatprep.subr.bf16.mxu0 %v3865_v59 }
0x156b   : > { %3282 = vmatprep.mubr.msk.f32.mxu1 %vm3866_vm15, %v3867_v0  ;;  %3315 = vmatprep.mubr.msk.f32.mxu0 %vm3866_vm15, %v3867_v0 }
0x156d   : > { %3441 = vmatpush3.bf16.msra.mxu1 %v3440_v25  ;;  %3459 = vmatpush3.bf16.msra.mxu0 %v3458_v26  ;;  %v2708_v26 = vld [vmem:[%s4696_s9] sm:$0x1] }
0x156e   : > { %3448 = vmatprep.subr.bf16.mxu1 %v3865_v59  ;;  %3466 = vmatprep.subr.bf16.mxu0 %v3865_v59 }
0x1570   : > { %3283 = vmatmul.mubr.msk.f32.vlgmr.msra.gmra.mrb[22].mxu1 %vm489_vm1, %v2175_v35  ;;  %3316 = vmatmul.mubr.msk.f32.vlgmr.msra.gmra.mrb[14].mxu0 %vm489_vm1, %v4501_v62 }
0x1571   : > { %3450 = vmatpush3.bf16.msra.mxu1 %v3449_v32  ;;  %3468 = vmatpush3.bf16.msra.mxu0 %v3467_v33 }
0x1572   : > { %3451 = vmatprep.subr.bf16.mxu1 %v3865_v59  ;;  %3469 = vmatprep.subr.bf16.mxu0 %v3865_v59 }
0x1573   : > { %3304 = vmatprep.mubr.msk.f32.mxu1 %vm3866_vm15, %v3867_v0  ;;  %3337 = vmatprep.mubr.msk.f32.mxu0 %vm3866_vm15, %v3867_v0 }
0x1575   : > { %3453 = vmatpush3.bf16.msra.mxu1 %v3452_v37  ;;  %3471 = vmatpush3.bf16.msra.mxu0 %v3470_v38 }
0x1576   : > { %3460 = vmatprep.subr.bf16.mxu1 %v3865_v59  ;;  %3478 = vmatprep.subr.bf16.mxu0 %v3865_v59 }
0x1578   : > { %3305 = vmatmul.mubr.msk.f32.vlgmr.msra.gmra.mrb[24].mxu1 %vm489_vm1, %v2341_v42  ;;  %3338 = vmatmul.mubr.msk.f32.vlgmr.msra.gmra.mrb[16].mxu0 %vm489_vm1, %v2559_v43 }
0x1579   : > { %3462 = vmatpush3.bf16.msra.mxu1 %v3461_v41  ;;  %3326 = vmatprep.mubr.msk.f32.mxu1 %vm3866_vm15, %v3867_v0 }
0x157a   : > { %3463 = vmatprep.subr.bf16.mxu1 %v3865_v59  ;;  %3367 = vmatprep.mubr.msk.f32.mxu0 %vm3866_vm15, %v3867_v0 }
0x157b   : > { %3480 = vmatpush3.bf16.msra.mxu0 %v3479_v57 }
0x157c   : > { %3481 = vmatprep.subr.bf16.mxu0 %v3865_v59 }
0x157d   : > { %3465 = vmatpush3.bf16.msra.mxu1 %v3464_v46 }
0x157e   : > { %3472 = vmatprep.subr.bf16.mxu1 %v3865_v59 }
0x1580   : > { %3327 = vmatmul.mubr.msk.f32.vlgmr.msra.gmra.mrb[26].mxu1 %vm489_vm1, %v2486_v50 }
0x1581   : > { %3474 = vmatpush3.bf16.msra.mxu1 %v3473_v49  ;;  %3348 = vmatprep.mubr.msk.f32.mxu1 %vm3866_vm15, %v3867_v0  ;;  %v2713_v0 = vld [vmem:[%s4697_s10 + $0x10] sm:$0xff] }
0x1582   : > { %3475 = vmatprep.subr.bf16.mxu1 %v3865_v59  ;;  %v3482_v5 = vpack.c.bf16 %v2714_v58, %v2713_v0 }
0x1584   : > { %3483 = vmatpush3.bf16.msra.mxu0 %v3482_v5 }
0x1585   : > { %3477 = vmatpush3.bf16.msra.mxu1 %v3476_v52  ;;  %3484 = vmatprep.subr.bf16.mxu0 %v3865_v59 }
0x1588   : > { %3349 = vmatmul.mubr.msk.f32.vlgmr.msra.gmra.mrb[28].mxu1 %vm489_vm1, %v2632_v3  ;;  %3486 = vmatpush3.bf16.msra.mxu0 %v3485_v61  ;;  %vm2793_vm1 = vcmask 122880  }
0x1589   : > { %3487 = vmatprep.subr.bf16.mxu0 %v3865_v59 }
0x158c   : > { %3489 = vmatpush3.bf16.msra.mxu0 %v3488_v8 }
0x163b   : > { %v2161_v10 = vpop.f32.mrb[20].mxu1  ;;  %v2327_v11 = vpop.f32.mrb[12].mxu0 }
0x163c   : > { %v3273_v12 = vpop.f32.mrb[21].mxu1  ;;  %v3295_v15 = vpop.f32.mrb[13].mxu0 }
0x1643   : > { %v2244_v13 = vpop.f32.mrb[22].mxu1  ;;  %v2482_v14 = vpop.f32.mrb[14].mxu0 }
0x1644   : > { %v2483_v1 = vadd.f32 %v2482_v14, %v2161_v10  ;;  %v3284_v4 = vpop.f32.mrb[23].mxu1  ;;  %v3317_v54 = vpop.f32.mrb[15].mxu0 }
0x164b   : > { %v2410_v59 = vpop.f32.mrb[24].mxu1  ;;  %v2628_v16 = vpop.f32.mrb[16].mxu0 }
0x164c   : > { %v2629_v2 = vadd.f32 %v2628_v16, %v2327_v11  ;;  %v3306_v62 = vpop.f32.mrb[25].mxu1  ;;  %v3339_v63 = vpop.f32.mrb[17].mxu0 }
0x1653   : > { %v2555_v55 = vpop.f32.mrb[26].mxu1 }
0x1654   : > { %v2556_v18 = vadd.f32 %v2555_v55, %v2244_v13  ;;  %v3328_v19 = vpop.f32.mrb[27].mxu1 }
0x1656   : > { %v2705_v20 = vadd.f32 %v2556_v18, %v2483_v1 }
0x165b   : > { %v2701_v21 = vpop.f32.mrb[28].mxu1 }
0x165c   : > { %v2702_v23 = vadd.f32 %v2701_v21, %v2410_v59  ;;  %v3350_v24 = vpop.f32.mrb[29].mxu1 }
0x165e   : > { %v2706_v25 = vadd.f32 %v2702_v23, %v2629_v2 }
0x1660   : > { %v2707_v28 = vadd.f32 %v2706_v25, %v2705_v20 }
0x1662   : > { %v2709_v29 = vadd.f32 %v2708_v26, %v2707_v28 }
0x1664   : > { %v2710_v30 = vmax.f32 %v2709_v29, 0.0 }
0x1666   : > { %3368 = vmatmul.mubr.msk.f32.vlgmr.msra.gmra.mrb[18].mxu0 %vm1264_vm5, %v2710_v30 }
0x1739   : > { %v2789_v32 = vpop.f32.mrb[18].mxu0 }
0x173a   : > { %v2790_v33 = vadd.f32 %v2789_v32, %v2719_v31  ;;  %v3369_v34 = vpop.f32.mrb[19].mxu0 }
0x173c   : > { %2794 = vst.msk [vmem:[%s483_s12] sm:$0x1] %vm2793_vm1, %v2790_v33 }
0x173d   : > { %3786 = shalt.err (!%p3783_p1)
}
0x173e   : > { %s3787_s3 = scalar_lea.hbm %s4643_s1, 16  ;;  %s3791_s15 = scalar_lea.hbm %s4731_s25, 32 }
0x173f   : > { %p3788_p3 = scmp.ne.s32.totalorder %s4643_s1, %s3787_s3  ;;  %p3792_p0 = scmp.lt.u32.totalorder %s4643_s1, %s4731_s25 }
0x1740   : > { %p3793_p2 = scmp.lt.u32.totalorder %s3791_s15, %s3787_s3  ;;  %p3795_p6 = scmp.lt.u32.totalorder %s3787_s3, %s4643_s1 }
0x1741   : > { %p3789_p9 = pnand %p3788_p3, %p4732_p10 }
0x1742   : > { %p3794_p8 = por %p3793_p2, %p3792_p0 }
0x1743   : > { %p3790_p13 = pneg %p3789_p9 }
0x1744   : > { %p3796_p11 = por %p3795_p6, %p3794_p8 }
0x1746   : > { %p3797_p12 = pnand %p3796_p11, %p3790_p13 }
0x1748   : > { %3800 = shalt.err (!%p3797_p12)
}
0x1749   : > { %3512 = dma.vmem_to_hbm [thread:$0]  (%p4732_p10), %s4645_s13, 16, %s4643_s1, %s2796_s19  }
0x174a PF: > { %s2820_s18 = sand.u32 1, %s3835_s21   ;;  %p4733_p5 = scmp.ne.s32.totalorder %s4721_s26, 0 }
0x174b   : > { %p4734_p7 = scmp.ge.s32.totalorder %s3847_s24, 2  ;;  %s2821_s20 = scalar_lea.sflag [#allocation4], %s2820_s18 }
0x174d   : > { %p3532_p4 = pnand %p4734_p7, %p4733_p5 }
0x174f   : > { %3830 = dma.done.wait (!%p3532_p4), %s2821_s20, 16  }
0x1750   : > { %3832 = vsyncadd (!%p3532_p4), %s2821_s20, 4294967280  ;;  %p27_p1 = scmp.ge.s32.totalorder %s4073_s17, 4   ;;  %s4735_s21 = smov %s3839_s22 }
0x1751   : > { %s4736_s22 = smov %s3843_s23  ;;  %s4737_s23 = smov %s4084_s29 }
0x1752   : > { %s4738_s24 = smov %s4073_s17  ;;  %29 = sbr.rel (!%p27_p1) target bundleno = 13 (0xd), region = 142 }
0x1759   :  { %2825 = vsyncpa [#allocation3], 1 }
0x175a   :  { %2827 = vsyncpa [#allocation3 + $0x1], 1 }
0x175b   :  { %2828 = vsyncpa [#allocation6], 1 }
0x175c   :  { %2829 = vsyncpa [#allocation9], 1 }
0x175d   :  { %2830 = vsyncpa [#allocation4], 1 }
0x175e   :  { %2832 = vsyncpa [#allocation4 + $0x1], 1 }

</bundles_post_ra>
